<compile_context>
chip_gen: v6e
topology: v6e:2x2x1
jax: 0.10.0
libtpu: 0.0.40
codegen_flags: <defaults>
</compile_context>

<pallas_src>
import functools
import math

import jax
import jax.numpy as jnp
from jax.experimental import pallas as pl
from jax.experimental.pallas import tpu as pltpu  # noqa: F401  (TPU backend)

LANE = 128


def _layernorm(x, w, b, eps=1e-5):
    # Matches torch.nn.LayerNorm(d_model, eps=1e-5) over the last dim.
    mu = jnp.mean(x, axis=-1, keepdims=True)
    var = jnp.mean((x - mu) ** 2, axis=-1, keepdims=True)
    return (x - mu) * jax.lax.rsqrt(var + eps) * w + b


def tc_fused_kernel(x_ref, qv_ref, ko_ref, w1_ref, w2_ref, vec_ref, o_ref, *,
                    nhead, num_layers):
    """Fully fused TC forward.

    Ref shapes:
      x_ref   (N, S, E)              activations (batch-major)
      qv_ref  (L*2H, E, Dh)          rows [l*2H + h] = Wq_h^T, [l*2H + H + h] = Wv_h^T
      ko_ref  (L*2H, Dh, E)          rows [l*2H + h] = Wk_h (K^T proj), [.. + H + h] = Wo_h^T
      w1_ref  (L, E, F), w2_ref (L, F, E)
      vec_ref (L+1, NV, 128)         all small per-layer vectors + classifier (last "layer")
      o_ref   (S, 128)               lane-dense padded sigmoid output
    """
    N, S, E = x_ref.shape
    H = nhead
    L = num_layers
    Dh = qv_ref.shape[-1]
    F = w1_ref.shape[-1]
    NS = N * S
    scale = 1.0 / math.sqrt(Dh)

    # Row indices inside the per-layer vector slab (must match wrapper packing).
    R_QB, R_VB = 0, H
    R_OUT_B = 2 * H
    R_LN1_W, R_LN1_B = 2 * H + 1, 2 * H + 2
    R_L1_B, R_L2_B = 2 * H + 3, 2 * H + 4
    R_LN2_W, R_LN2_B = 2 * H + 5, 2 * H + 6

    def layer_body(l, x2):
        vecs = vec_ref[l]                       # (NV, 128): all small per-layer vectors
        wb = l * (2 * H)                        # base row into per-head weight stacks

        x3 = x2.reshape(N, S, E)
        # Single explicit (S, E)->(E, S) transpose per layer; K is then projected
        # straight into (Dh, S) layout, so no per-head implicit K transpose ever
        # appears on the scores path.
        x3t = jnp.transpose(x3, (0, 2, 1))      # (N, E, S)

        attn = jnp.zeros((NS, E), jnp.float32)
        for h in range(H):                      # H is tiny & static; weights pre-split
            q_w = qv_ref[wb + h]                # (E, Dh)
            v_w = qv_ref[wb + H + h]            # (E, Dh)
            kT_w = ko_ref[wb + h]               # (Dh, E)
            oT_w = ko_ref[wb + H + h]           # (Dh, E)

            qh = (jnp.dot(x2, q_w, preferred_element_type=jnp.float32)
                  + vecs[R_QB + h, :Dh]).reshape(N, S, Dh)
            vh = (jnp.dot(x2, v_w, preferred_element_type=jnp.float32)
                  + vecs[R_VB + h, :Dh]).reshape(N, S, Dh)
            kT = jnp.einsum('nde,nes->nds',
                            jnp.broadcast_to(kT_w, (N, Dh, E)), x3t,
                            preferred_element_type=jnp.float32)        # (N, Dh, S)
            # K-projection bias dropped: it adds the same constant to every score
            # in a row and softmax is invariant to row-constant shifts.
            s = jnp.einsum('nqd,nds->nqs', qh, kT,
                           preferred_element_type=jnp.float32) * scale  # (N, S, S)
            m = jnp.max(s, axis=-1, keepdims=True)
            e = jnp.exp(s - m)
            # Exact reciprocal kept on purpose (kernel is overhead/latency bound,
            # not VALU bound); pl.reciprocal(..., approx=True) is the EUP option.
            p = e * pl.reciprocal(jnp.sum(e, axis=-1, keepdims=True))
            oh = jnp.einsum('nqs,nsd->nqd', p, vh,
                            preferred_element_type=jnp.float32)         # (N, S, Dh)
            # Per-head accumulation of the output projection (no lane concat).
            attn = attn + jnp.dot(oh.reshape(NS, Dh), oT_w,
                                  preferred_element_type=jnp.float32)
        attn = attn + vecs[R_OUT_B, :E]

        y = _layernorm(x2 + attn, vecs[R_LN1_W, :E], vecs[R_LN1_B, :E])

        h1 = jnp.dot(y, w1_ref[l], preferred_element_type=jnp.float32) + vecs[R_L1_B, :F]
        h1 = jnp.maximum(h1, 0.0)                                        # ReLU
        ff = jnp.dot(h1, w2_ref[l], preferred_element_type=jnp.float32) + vecs[R_L2_B, :E]
        return _layernorm(y + ff, vecs[R_LN2_W, :E], vecs[R_LN2_B, :E])

    x0 = x_ref[...].astype(jnp.float32).reshape(NS, E)
    x2 = jax.lax.fori_loop(0, L, layer_body, x0)

    # classifier( x[:, -1, :] ): for the (S, N, E) PyTorch input this is the LAST
    # BATCH element at every sequence position -> rows (N-1)*S .. N*S of the
    # batch-major (N*S, E) slab.
    x_last = x2[(N - 1) * S:, :]                       # (S, E)
    cls = vec_ref[L]                                   # rows 0..E-1 = W^T (padded), row E = bias
    logits = (jnp.dot(x_last, cls[:E, :], preferred_element_type=jnp.float32)
              + cls[E, :])                             # (S, 128) lane-dense
    # TODO(synk): classifier Dropout(p=0.2) is identity here (eval semantics).
    # Numerically safe sigmoid via tanh (EUP path, no exp overflow).
    o_ref[...] = 0.5 * (jnp.tanh(0.5 * logits) + 1.0)


def tc_forward(x_sne, layer_params, cls_w, cls_b, nhead):
    """Full TC forward.  x_sne: (S, N, E) as in PyTorch (batch_first=False)."""
    S, N, E = x_sne.shape
    L = len(layer_params)
    H = nhead
    Dh = E // H
    F = layer_params[0]["lin1_w"].shape[0]
    O = cls_w.shape[0]
    NV = ((max(2 * H + 7, E + 1) + 7) // 8) * 8        # slab rows per layer (sublane-aligned)

    # Embedding() is identity.  Transpose to batch-major once at the boundary.
    x_nse = jnp.transpose(x_sne, (1, 0, 2)).astype(jnp.float32)          # (N, S, E)

    def pad_lane(v):
        v = jnp.asarray(v, jnp.float32).reshape(-1)
        return jnp.pad(v, (0, LANE - v.shape[0]))

    qv_rows, ko_rows, w1_list, w2_list, vec_layers = [], [], [], [], []
    for p in layer_params:
        in_wT = jnp.asarray(p["in_w"], jnp.float32).T                    # (E, 3E) = [q|k|v]
        q_wT, k_wT, v_wT = in_wT[:, :E], in_wT[:, E:2 * E], in_wT[:, 2 * E:]
        out_wT = jnp.asarray(p["out_w"], jnp.float32).T                  # (E, E)
        for h in range(H):
            qv_rows.append(q_wT[:, h * Dh:(h + 1) * Dh])                 # (E, Dh)
        for h in range(H):
            qv_rows.append(v_wT[:, h * Dh:(h + 1) * Dh])                 # (E, Dh)
        for h in range(H):
            ko_rows.append(k_wT[:, h * Dh:(h + 1) * Dh].T)               # (Dh, E): K^T projection
        for h in range(H):
            ko_rows.append(out_wT[h * Dh:(h + 1) * Dh, :])               # (Dh, E): out-proj slice
        w1_list.append(jnp.asarray(p["lin1_w"], jnp.float32).T)          # (E, F)
        w2_list.append(jnp.asarray(p["lin2_w"], jnp.float32).T)          # (F, E)

        in_b = jnp.asarray(p["in_b"], jnp.float32).reshape(-1)
        q_b, v_b = in_b[:E], in_b[2 * E:]
        rows = ([pad_lane(q_b[h * Dh:(h + 1) * Dh]) for h in range(H)]
                + [pad_lane(v_b[h * Dh:(h + 1) * Dh]) for h in range(H)]
                + [pad_lane(p["out_b"]), pad_lane(p["ln1_w"]), pad_lane(p["ln1_b"]),
                   pad_lane(p["lin1_b"]), pad_lane(p["lin2_b"]),
                   pad_lane(p["ln2_w"]), pad_lane(p["ln2_b"])])
        rows += [jnp.zeros((LANE,), jnp.float32)] * (NV - len(rows))
        vec_layers.append(jnp.stack(rows))

    # Classifier packed as the last "layer" of the vector slab.
    cls_wT = jnp.asarray(cls_w, jnp.float32).T                            # (E, O)
    cls_rows = [pad_lane(cls_wT[r]) for r in range(E)] + [pad_lane(cls_b)]
    cls_rows += [jnp.zeros((LANE,), jnp.float32)] * (NV - len(cls_rows))
    vec_layers.append(jnp.stack(cls_rows))

    qv_w = jnp.stack(qv_rows)            # (L*2H, E, Dh)
    ko_wT = jnp.stack(ko_rows)           # (L*2H, Dh, E)
    w1T = jnp.stack(w1_list)             # (L, E, F)
    w2T = jnp.stack(w2_list)             # (L, F, E)
    vec = jnp.stack(vec_layers)          # (L+1, NV, 128)

    args = [x_nse, qv_w, ko_wT, w1T, w2T, vec]

    def full_spec(a):
        nd = a.ndim
        return pl.BlockSpec(a.shape, lambda *_: (0,) * nd)

    # Single fused invocation, no grid: everything VMEM-resident.  (On v7x with
    # real batch sizes, add a "parallel" batch grid axis to use both TCs.)
    out_pad = pl.pallas_call(
        functools.partial(tc_fused_kernel, nhead=H, num_layers=L),
        out_shape=jax.ShapeDtypeStruct((S, LANE), jnp.float32),
        in_specs=[full_spec(a) for a in args],
        out_specs=pl.BlockSpec((S, LANE), lambda *_: (0, 0)),
    )(*args)
    return out_pad[:, :O]


def tc_reference(x_sne, layer_params, cls_w, cls_b, nhead):
    """Pure-JAX reference with PyTorch TransformerEncoderLayer (post-norm) semantics."""
    S, N, E = x_sne.shape
    H = nhead
    Dh = E // H
    x = jnp.transpose(x_sne, (1, 0, 2)).astype(jnp.float32)              # (N, S, E)
    for p in layer_params:
        qkv = jnp.einsum('nse,fe->nsf', x, p["in_w"]) + p["in_b"]
        q, k, v = qkv[..., :E], qkv[..., E:2 * E], qkv[..., 2 * E:]
        split = lambda t: t.reshape(N, S, H, Dh).transpose(0, 2, 1, 3)    # (N, H, S, Dh)
        q, k, v = split(q), split(k), split(v)
        s = jnp.einsum('nhqd,nhkd->nhqk', q, k) / math.sqrt(Dh)
        a = jax.nn.softmax(s, axis=-1)
        o = jnp.einsum('nhqk,nhkd->nhqd', a, v).transpose(0, 2, 1, 3).reshape(N, S, E)
        attn = jnp.einsum('nse,fe->nsf', o, p["out_w"]) + p["out_b"]
        x = _layernorm(x + attn, p["ln1_w"], p["ln1_b"])
        h1 = jax.nn.relu(jnp.einsum('nse,fe->nsf', x, p["lin1_w"]) + p["lin1_b"])
        ff = jnp.einsum('nsf,ef->nse', h1, p["lin2_w"]) + p["lin2_b"]
        x = _layernorm(x + ff, p["ln2_w"], p["ln2_b"])
    x_last = x[-1]                                                        # (S, E): x[:, -1, :]
    return jax.nn.sigmoid(x_last @ jnp.asarray(cls_w).T + cls_b)


def make_layer_params(key, E, F):
    ks = jax.random.split(key, 12)
    s = 0.15
    return dict(
        in_w=jax.random.normal(ks[0], (3 * E, E), jnp.float32) * s,
        in_b=jax.random.normal(ks[1], (3 * E,), jnp.float32) * 0.05,
        out_w=jax.random.normal(ks[2], (E, E), jnp.float32) * s,
        out_b=jax.random.normal(ks[3], (E,), jnp.float32) * 0.05,
        ln1_w=1.0 + jax.random.normal(ks[4], (E,), jnp.float32) * 0.05,
        ln1_b=jax.random.normal(ks[5], (E,), jnp.float32) * 0.05,
        lin1_w=jax.random.normal(ks[6], (F, E), jnp.float32) * s,
        lin1_b=jax.random.normal(ks[7], (F,), jnp.float32) * 0.05,
        lin2_w=jax.random.normal(ks[8], (E, F), jnp.float32) * s,
        lin2_b=jax.random.normal(ks[9], (E,), jnp.float32) * 0.05,
        ln2_w=1.0 + jax.random.normal(ks[10], (E,), jnp.float32) * 0.05,
        ln2_b=jax.random.normal(ks[11], (E,), jnp.float32) * 0.05,
    )


if __name__ == "__main__":
    # Small, consistent shapes: d_model divisible by nhead=3.
    d_model, nhead, num_layers = 12, 3, 6
    dim_feedforward, out_features = 32, 2
    S, N = 8, 2                                       # seq len, batch

    key = jax.random.PRNGKey(0)
    keys = jax.random.split(key, num_layers + 2)

    layer_params = [make_layer_params(keys[i], d_model, dim_feedforward)
                    for i in range(num_layers)]
    kc = jax.random.split(keys[num_layers], 2)
    cls_w = jax.random.normal(kc[0], (out_features, d_model), jnp.float32) * 0.2
    cls_b = jax.random.normal(kc[1], (out_features,), jnp.float32) * 0.1

    x = jax.random.normal(keys[num_layers + 1], (S, N, d_model), jnp.float32)

    out = jax.block_until_ready(tc_forward(x, layer_params, cls_w, cls_b, nhead))
    ref = jax.block_until_ready(tc_reference(x, layer_params, cls_w, cls_b, nhead))

    assert out.shape == (S, out_features)
    assert bool(jnp.all(jnp.isfinite(out)))
    assert bool(jnp.all((out >= 0.0) & (out <= 1.0)))
    max_err = float(jnp.max(jnp.abs(out - ref)))
    assert max_err < 2e-4, f"kernel mismatch vs pure-JAX reference: max_err={max_err}"
    print("KERNEL_OK")
</pallas_src>

<mosaic_0001>
module attributes {stable_mosaic.version = 11 : i64} {
  func.func @tc_fused_kernel(%arg0: memref<2x8x12xf32, #tpu.memory_space<vmem>>, %arg1: memref<36x12x4xf32, #tpu.memory_space<vmem>>, %arg2: memref<36x4x12xf32, #tpu.memory_space<vmem>>, %arg3: memref<6x12x32xf32, #tpu.memory_space<vmem>>, %arg4: memref<6x32x12xf32, #tpu.memory_space<vmem>>, %arg5: memref<7x16x128xf32, #tpu.memory_space<vmem>>, %arg6: memref<8x128xf32, #tpu.memory_space<vmem>>) attributes {dimension_semantics = [], scalar_prefetch = 0 : i64, scratch_operands = 0 : i64, tpu.core_type = #tpu.core_type<tc>} {
    %c0 = arith.constant 0 : index
    %c0_0 = arith.constant 0 : index
    %c0_1 = arith.constant 0 : index
    %0 = vector.load %arg0[%c0, %c0_0, %c0_1] : memref<2x8x12xf32, #tpu.memory_space<vmem>>, vector<2x8x12xf32>
    %1 = vector.shape_cast %0 : vector<2x8x12xf32> to vector<16x12xf32>
    %c0_i32 = arith.constant 0 : i32
    %c6_i32 = arith.constant 6 : i32
    %2 = arith.addi %c0_i32, %c6_i32 : i32
    %c1_i32 = arith.constant 1 : i32
    %3 = scf.for %arg7 = %c0_i32 to %2 step %c1_i32 iter_args(%arg8 = %1) -> (vector<16x12xf32>)  : i32 {
      %22 = arith.index_cast %arg7 : i32 to index
      %c0_10 = arith.constant 0 : index
      %c0_11 = arith.constant 0 : index
      %23 = vector.load %arg5[%22, %c0_10, %c0_11] : memref<7x16x128xf32, #tpu.memory_space<vmem>>, vector<1x16x128xf32>
      %24 = vector.shape_cast %23 : vector<1x16x128xf32> to vector<16x128xf32>
      %c6_i32_12 = arith.constant 6 : i32
      %25 = arith.muli %arg7, %c6_i32_12 : i32
      %26 = vector.shape_cast %arg8 : vector<16x12xf32> to vector<2x8x12xf32>
      %27 = tpu.transpose %26, [0, 2, 1] : vector<2x8x12xf32> -> vector<2x12x8xf32>
      %cst_13 = arith.constant 0.000000e+00 : f32
      %28 = vector.broadcast %cst_13 : f32 to vector<16x12xf32>
      %c0_i32_14 = arith.constant 0 : i32
      %29 = arith.addi %25, %c0_i32_14 : i32
      %30 = arith.index_cast %29 : i32 to index
      %c0_15 = arith.constant 0 : index
      %c0_16 = arith.constant 0 : index
      %31 = vector.load %arg1[%30, %c0_15, %c0_16] : memref<36x12x4xf32, #tpu.memory_space<vmem>>, vector<1x12x4xf32>
      %32 = vector.shape_cast %31 : vector<1x12x4xf32> to vector<12x4xf32>
      %c3_i32 = arith.constant 3 : i32
      %33 = arith.addi %25, %c3_i32 : i32
      %c0_i32_17 = arith.constant 0 : i32
      %34 = arith.addi %33, %c0_i32_17 : i32
      %35 = arith.index_cast %34 : i32 to index
      %c0_18 = arith.constant 0 : index
      %c0_19 = arith.constant 0 : index
      %36 = vector.load %arg1[%35, %c0_18, %c0_19] : memref<36x12x4xf32, #tpu.memory_space<vmem>>, vector<1x12x4xf32>
      %37 = vector.shape_cast %36 : vector<1x12x4xf32> to vector<12x4xf32>
      %c0_i32_20 = arith.constant 0 : i32
      %38 = arith.addi %25, %c0_i32_20 : i32
      %39 = arith.index_cast %38 : i32 to index
      %c0_21 = arith.constant 0 : index
      %c0_22 = arith.constant 0 : index
      %40 = vector.load %arg2[%39, %c0_21, %c0_22] : memref<36x4x12xf32, #tpu.memory_space<vmem>>, vector<1x4x12xf32>
      %41 = vector.shape_cast %40 : vector<1x4x12xf32> to vector<4x12xf32>
      %c3_i32_23 = arith.constant 3 : i32
      %42 = arith.addi %25, %c3_i32_23 : i32
      %c0_i32_24 = arith.constant 0 : i32
      %43 = arith.addi %42, %c0_i32_24 : i32
      %44 = arith.index_cast %43 : i32 to index
      %c0_25 = arith.constant 0 : index
      %c0_26 = arith.constant 0 : index
      %45 = vector.load %arg2[%44, %c0_25, %c0_26] : memref<36x4x12xf32, #tpu.memory_space<vmem>>, vector<1x4x12xf32>
      %46 = vector.shape_cast %45 : vector<1x4x12xf32> to vector<4x12xf32>
      %cst_27 = arith.constant dense<0.000000e+00> : vector<16x4xf32>
      %47 = tpu.matmul %arg8, %32, %cst_27 {dimension_numbers = #tpu.dot_dimension_numbers<[1], [0], [0], [1], [0, 0, 1, 1], [], []>} : vector<16x12xf32>, vector<12x4xf32>, vector<16x4xf32> -> vector<16x4xf32>
      %48 = vector.extract_strided_slice %24 {offsets = [0, 0], sizes = [1, 4], strides = [1, 1]} : vector<16x128xf32> to vector<1x4xf32>
      %49 = vector.shape_cast %48 : vector<1x4xf32> to vector<4xf32>
      %50 = vector.shape_cast %49 : vector<4xf32> to vector<1x4xf32>
      %51 = vector.broadcast %50 : vector<1x4xf32> to vector<16x4xf32>
      %52 = arith.addf %47, %51 : vector<16x4xf32>
      %53 = vector.shape_cast %52 : vector<16x4xf32> to vector<2x8x4xf32>
      %cst_28 = arith.constant dense<0.000000e+00> : vector<16x4xf32>
      %54 = tpu.matmul %arg8, %37, %cst_28 {dimension_numbers = #tpu.dot_dimension_numbers<[1], [0], [0], [1], [0, 0, 1, 1], [], []>} : vector<16x12xf32>, vector<12x4xf32>, vector<16x4xf32> -> vector<16x4xf32>
      %55 = vector.extract_strided_slice %24 {offsets = [3, 0], sizes = [1, 4], strides = [1, 1]} : vector<16x128xf32> to vector<1x4xf32>
      %56 = vector.shape_cast %55 : vector<1x4xf32> to vector<4xf32>
      %57 = vector.shape_cast %56 : vector<4xf32> to vector<1x4xf32>
      %58 = vector.broadcast %57 : vector<1x4xf32> to vector<16x4xf32>
      %59 = arith.addf %54, %58 : vector<16x4xf32>
      %60 = vector.shape_cast %59 : vector<16x4xf32> to vector<2x8x4xf32>
      %61 = vector.shape_cast %41 : vector<4x12xf32> to vector<1x4x12xf32>
      %62 = vector.broadcast %61 : vector<1x4x12xf32> to vector<2x4x12xf32>
      "tpu.trace_start"() <{level = 10 : i32, message = "nde,nes->nds"}> : () -> ()
      %cst_29 = arith.constant dense<0.000000e+00> : vector<2x4x8xf32>
      %63 = tpu.matmul %62, %27, %cst_29 {dimension_numbers = #tpu.dot_dimension_numbers<[2], [1], [1], [2], [0, 0, 0, 1, 1, 2], [0], [0]>} : vector<2x4x12xf32>, vector<2x12x8xf32>, vector<2x4x8xf32> -> vector<2x4x8xf32>
      "tpu.trace_stop"() : () -> ()
      "tpu.trace_start"() <{level = 10 : i32, message = "nqd,nds->nqs"}> : () -> ()
      %cst_30 = arith.constant dense<0.000000e+00> : vector<2x8x8xf32>
      %64 = tpu.matmul %53, %63, %cst_30 {dimension_numbers = #tpu.dot_dimension_numbers<[2], [1], [1], [2], [0, 0, 0, 1, 1, 2], [0], [0]>} : vector<2x8x4xf32>, vector<2x4x8xf32>, vector<2x8x8xf32> -> vector<2x8x8xf32>
      "tpu.trace_stop"() : () -> ()
      %cst_31 = arith.constant 5.000000e-01 : f32
      %65 = vector.broadcast %cst_31 : f32 to vector<2x8x8xf32>
      %66 = arith.mulf %64, %65 : vector<2x8x8xf32>
      %cst_32 = arith.constant dense<0xFF800000> : vector<2x8xf32>
      %67 = vector.multi_reduction <maximumf>, %66, %cst_32 [2] : vector<2x8x8xf32> to vector<2x8xf32>
      %68 = vector.shape_cast %67 : vector<2x8xf32> to vector<2x8x1xf32>
      %69 = vector.broadcast %68 : vector<2x8x1xf32> to vector<2x8x8xf32>
      %70 = arith.subf %66, %69 : vector<2x8x8xf32>
      %71 = math.exp %70 : vector<2x8x8xf32>
      %cst_33 = arith.constant dense<0.000000e+00> : vector<2x8xf32>
      %72 = vector.multi_reduction <add>, %71, %cst_33 [2] : vector<2x8x8xf32> to vector<2x8xf32>
      %73 = vector.shape_cast %72 : vector<2x8xf32> to vector<2x8x1xf32>
      %74 = tpu.reciprocal %73 : vector<2x8x1xf32> -> vector<2x8x1xf32>
      %75 = vector.broadcast %74 : vector<2x8x1xf32> to vector<2x8x8xf32>
      %76 = arith.mulf %71, %75 : vector<2x8x8xf32>
      "tpu.trace_start"() <{level = 10 : i32, message = "nqs,nsd->nqd"}> : () -> ()
      %cst_34 = arith.constant dense<0.000000e+00> : vector<2x8x4xf32>
      %77 = tpu.matmul %76, %60, %cst_34 {dimension_numbers = #tpu.dot_dimension_numbers<[2], [1], [1], [2], [0, 0, 0, 1, 1, 2], [0], [0]>} : vector<2x8x8xf32>, vector<2x8x4xf32>, vector<2x8x4xf32> -> vector<2x8x4xf32>
      "tpu.trace_stop"() : () -> ()
      %78 = vector.shape_cast %77 : vector<2x8x4xf32> to vector<16x4xf32>
      %cst_35 = arith.constant dense<0.000000e+00> : vector<16x12xf32>
      %79 = tpu.matmul %78, %46, %cst_35 {dimension_numbers = #tpu.dot_dimension_numbers<[1], [0], [0], [1], [0, 0, 1, 1], [], []>} : vector<16x4xf32>, vector<4x12xf32>, vector<16x12xf32> -> vector<16x12xf32>
      %80 = arith.addf %28, %79 : vector<16x12xf32>
      %c1_i32_36 = arith.constant 1 : i32
      %81 = arith.addi %25, %c1_i32_36 : i32
      %82 = arith.index_cast %81 : i32 to index
      %c0_37 = arith.constant 0 : index
      %c0_38 = arith.constant 0 : index
      %83 = vector.load %arg1[%82, %c0_37, %c0_38] : memref<36x12x4xf32, #tpu.memory_space<vmem>>, vector<1x12x4xf32>
      %84 = vector.shape_cast %83 : vector<1x12x4xf32> to vector<12x4xf32>
      %c3_i32_39 = arith.constant 3 : i32
      %85 = arith.addi %25, %c3_i32_39 : i32
      %c1_i32_40 = arith.constant 1 : i32
      %86 = arith.addi %85, %c1_i32_40 : i32
      %87 = arith.index_cast %86 : i32 to index
      %c0_41 = arith.constant 0 : index
      %c0_42 = arith.constant 0 : index
      %88 = vector.load %arg1[%87, %c0_41, %c0_42] : memref<36x12x4xf32, #tpu.memory_space<vmem>>, vector<1x12x4xf32>
      %89 = vector.shape_cast %88 : vector<1x12x4xf32> to vector<12x4xf32>
      %c1_i32_43 = arith.constant 1 : i32
      %90 = arith.addi %25, %c1_i32_43 : i32
      %91 = arith.index_cast %90 : i32 to index
      %c0_44 = arith.constant 0 : index
      %c0_45 = arith.constant 0 : index
      %92 = vector.load %arg2[%91, %c0_44, %c0_45] : memref<36x4x12xf32, #tpu.memory_space<vmem>>, vector<1x4x12xf32>
      %93 = vector.shape_cast %92 : vector<1x4x12xf32> to vector<4x12xf32>
      %c3_i32_46 = arith.constant 3 : i32
      %94 = arith.addi %25, %c3_i32_46 : i32
      %c1_i32_47 = arith.constant 1 : i32
      %95 = arith.addi %94, %c1_i32_47 : i32
      %96 = arith.index_cast %95 : i32 to index
      %c0_48 = arith.constant 0 : index
      %c0_49 = arith.constant 0 : index
      %97 = vector.load %arg2[%96, %c0_48, %c0_49] : memref<36x4x12xf32, #tpu.memory_space<vmem>>, vector<1x4x12xf32>
      %98 = vector.shape_cast %97 : vector<1x4x12xf32> to vector<4x12xf32>
      %cst_50 = arith.constant dense<0.000000e+00> : vector<16x4xf32>
      %99 = tpu.matmul %arg8, %84, %cst_50 {dimension_numbers = #tpu.dot_dimension_numbers<[1], [0], [0], [1], [0, 0, 1, 1], [], []>} : vector<16x12xf32>, vector<12x4xf32>, vector<16x4xf32> -> vector<16x4xf32>
      %100 = vector.extract_strided_slice %24 {offsets = [1, 0], sizes = [1, 4], strides = [1, 1]} : vector<16x128xf32> to vector<1x4xf32>
      %101 = vector.shape_cast %100 : vector<1x4xf32> to vector<4xf32>
      %102 = vector.shape_cast %101 : vector<4xf32> to vector<1x4xf32>
      %103 = vector.broadcast %102 : vector<1x4xf32> to vector<16x4xf32>
      %104 = arith.addf %99, %103 : vector<16x4xf32>
      %105 = vector.shape_cast %104 : vector<16x4xf32> to vector<2x8x4xf32>
      %cst_51 = arith.constant dense<0.000000e+00> : vector<16x4xf32>
      %106 = tpu.matmul %arg8, %89, %cst_51 {dimension_numbers = #tpu.dot_dimension_numbers<[1], [0], [0], [1], [0, 0, 1, 1], [], []>} : vector<16x12xf32>, vector<12x4xf32>, vector<16x4xf32> -> vector<16x4xf32>
      %107 = vector.extract_strided_slice %24 {offsets = [4, 0], sizes = [1, 4], strides = [1, 1]} : vector<16x128xf32> to vector<1x4xf32>
      %108 = vector.shape_cast %107 : vector<1x4xf32> to vector<4xf32>
      %109 = vector.shape_cast %108 : vector<4xf32> to vector<1x4xf32>
      %110 = vector.broadcast %109 : vector<1x4xf32> to vector<16x4xf32>
      %111 = arith.addf %106, %110 : vector<16x4xf32>
      %112 = vector.shape_cast %111 : vector<16x4xf32> to vector<2x8x4xf32>
      %113 = vector.shape_cast %93 : vector<4x12xf32> to vector<1x4x12xf32>
      %114 = vector.broadcast %113 : vector<1x4x12xf32> to vector<2x4x12xf32>
      "tpu.trace_start"() <{level = 10 : i32, message = "nde,nes->nds"}> : () -> ()
      %cst_52 = arith.constant dense<0.000000e+00> : vector<2x4x8xf32>
      %115 = tpu.matmul %114, %27, %cst_52 {dimension_numbers = #tpu.dot_dimension_numbers<[2], [1], [1], [2], [0, 0, 0, 1, 1, 2], [0], [0]>} : vector<2x4x12xf32>, vector<2x12x8xf32>, vector<2x4x8xf32> -> vector<2x4x8xf32>
      "tpu.trace_stop"() : () -> ()
      "tpu.trace_start"() <{level = 10 : i32, message = "nqd,nds->nqs"}> : () -> ()
      %cst_53 = arith.constant dense<0.000000e+00> : vector<2x8x8xf32>
      %116 = tpu.matmul %105, %115, %cst_53 {dimension_numbers = #tpu.dot_dimension_numbers<[2], [1], [1], [2], [0, 0, 0, 1, 1, 2], [0], [0]>} : vector<2x8x4xf32>, vector<2x4x8xf32>, vector<2x8x8xf32> -> vector<2x8x8xf32>
      "tpu.trace_stop"() : () -> ()
      %cst_54 = arith.constant 5.000000e-01 : f32
      %117 = vector.broadcast %cst_54 : f32 to vector<2x8x8xf32>
      %118 = arith.mulf %116, %117 : vector<2x8x8xf32>
      %cst_55 = arith.constant dense<0xFF800000> : vector<2x8xf32>
      %119 = vector.multi_reduction <maximumf>, %118, %cst_55 [2] : vector<2x8x8xf32> to vector<2x8xf32>
      %120 = vector.shape_cast %119 : vector<2x8xf32> to vector<2x8x1xf32>
      %121 = vector.broadcast %120 : vector<2x8x1xf32> to vector<2x8x8xf32>
      %122 = arith.subf %118, %121 : vector<2x8x8xf32>
      %123 = math.exp %122 : vector<2x8x8xf32>
      %cst_56 = arith.constant dense<0.000000e+00> : vector<2x8xf32>
      %124 = vector.multi_reduction <add>, %123, %cst_56 [2] : vector<2x8x8xf32> to vector<2x8xf32>
      %125 = vector.shape_cast %124 : vector<2x8xf32> to vector<2x8x1xf32>
      %126 = tpu.reciprocal %125 : vector<2x8x1xf32> -> vector<2x8x1xf32>
      %127 = vector.broadcast %126 : vector<2x8x1xf32> to vector<2x8x8xf32>
      %128 = arith.mulf %123, %127 : vector<2x8x8xf32>
      "tpu.trace_start"() <{level = 10 : i32, message = "nqs,nsd->nqd"}> : () -> ()
      %cst_57 = arith.constant dense<0.000000e+00> : vector<2x8x4xf32>
      %129 = tpu.matmul %128, %112, %cst_57 {dimension_numbers = #tpu.dot_dimension_numbers<[2], [1], [1], [2], [0, 0, 0, 1, 1, 2], [0], [0]>} : vector<2x8x8xf32>, vector<2x8x4xf32>, vector<2x8x4xf32> -> vector<2x8x4xf32>
      "tpu.trace_stop"() : () -> ()
      %130 = vector.shape_cast %129 : vector<2x8x4xf32> to vector<16x4xf32>
      %cst_58 = arith.constant dense<0.000000e+00> : vector<16x12xf32>
      %131 = tpu.matmul %130, %98, %cst_58 {dimension_numbers = #tpu.dot_dimension_numbers<[1], [0], [0], [1], [0, 0, 1, 1], [], []>} : vector<16x4xf32>, vector<4x12xf32>, vector<16x12xf32> -> vector<16x12xf32>
      %132 = arith.addf %80, %131 : vector<16x12xf32>
      %c2_i32 = arith.constant 2 : i32
      %133 = arith.addi %25, %c2_i32 : i32
      %134 = arith.index_cast %133 : i32 to index
      %c0_59 = arith.constant 0 : index
      %c0_60 = arith.constant 0 : index
      %135 = vector.load %arg1[%134, %c0_59, %c0_60] : memref<36x12x4xf32, #tpu.memory_space<vmem>>, vector<1x12x4xf32>
      %136 = vector.shape_cast %135 : vector<1x12x4xf32> to vector<12x4xf32>
      %c3_i32_61 = arith.constant 3 : i32
      %137 = arith.addi %25, %c3_i32_61 : i32
      %c2_i32_62 = arith.constant 2 : i32
      %138 = arith.addi %137, %c2_i32_62 : i32
      %139 = arith.index_cast %138 : i32 to index
      %c0_63 = arith.constant 0 : index
      %c0_64 = arith.constant 0 : index
      %140 = vector.load %arg1[%139, %c0_63, %c0_64] : memref<36x12x4xf32, #tpu.memory_space<vmem>>, vector<1x12x4xf32>
      %141 = vector.shape_cast %140 : vector<1x12x4xf32> to vector<12x4xf32>
      %c2_i32_65 = arith.constant 2 : i32
      %142 = arith.addi %25, %c2_i32_65 : i32
      %143 = arith.index_cast %142 : i32 to index
      %c0_66 = arith.constant 0 : index
      %c0_67 = arith.constant 0 : index
      %144 = vector.load %arg2[%143, %c0_66, %c0_67] : memref<36x4x12xf32, #tpu.memory_space<vmem>>, vector<1x4x12xf32>
      %145 = vector.shape_cast %144 : vector<1x4x12xf32> to vector<4x12xf32>
      %c3_i32_68 = arith.constant 3 : i32
      %146 = arith.addi %25, %c3_i32_68 : i32
      %c2_i32_69 = arith.constant 2 : i32
      %147 = arith.addi %146, %c2_i32_69 : i32
      %148 = arith.index_cast %147 : i32 to index
      %c0_70 = arith.constant 0 : index
      %c0_71 = arith.constant 0 : index
      %149 = vector.load %arg2[%148, %c0_70, %c0_71] : memref<36x4x12xf32, #tpu.memory_space<vmem>>, vector<1x4x12xf32>
      %150 = vector.shape_cast %149 : vector<1x4x12xf32> to vector<4x12xf32>
      %cst_72 = arith.constant dense<0.000000e+00> : vector<16x4xf32>
      %151 = tpu.matmul %arg8, %136, %cst_72 {dimension_numbers = #tpu.dot_dimension_numbers<[1], [0], [0], [1], [0, 0, 1, 1], [], []>} : vector<16x12xf32>, vector<12x4xf32>, vector<16x4xf32> -> vector<16x4xf32>
      %152 = vector.extract_strided_slice %24 {offsets = [2, 0], sizes = [1, 4], strides = [1, 1]} : vector<16x128xf32> to vector<1x4xf32>
      %153 = vector.shape_cast %152 : vector<1x4xf32> to vector<4xf32>
      %154 = vector.shape_cast %153 : vector<4xf32> to vector<1x4xf32>
      %155 = vector.broadcast %154 : vector<1x4xf32> to vector<16x4xf32>
      %156 = arith.addf %151, %155 : vector<16x4xf32>
      %157 = vector.shape_cast %156 : vector<16x4xf32> to vector<2x8x4xf32>
      %cst_73 = arith.constant dense<0.000000e+00> : vector<16x4xf32>
      %158 = tpu.matmul %arg8, %141, %cst_73 {dimension_numbers = #tpu.dot_dimension_numbers<[1], [0], [0], [1], [0, 0, 1, 1], [], []>} : vector<16x12xf32>, vector<12x4xf32>, vector<16x4xf32> -> vector<16x4xf32>
      %159 = vector.extract_strided_slice %24 {offsets = [5, 0], sizes = [1, 4], strides = [1, 1]} : vector<16x128xf32> to vector<1x4xf32>
      %160 = vector.shape_cast %159 : vector<1x4xf32> to vector<4xf32>
      %161 = vector.shape_cast %160 : vector<4xf32> to vector<1x4xf32>
      %162 = vector.broadcast %161 : vector<1x4xf32> to vector<16x4xf32>
      %163 = arith.addf %158, %162 : vector<16x4xf32>
      %164 = vector.shape_cast %163 : vector<16x4xf32> to vector<2x8x4xf32>
      %165 = vector.shape_cast %145 : vector<4x12xf32> to vector<1x4x12xf32>
      %166 = vector.broadcast %165 : vector<1x4x12xf32> to vector<2x4x12xf32>
      "tpu.trace_start"() <{level = 10 : i32, message = "nde,nes->nds"}> : () -> ()
      %cst_74 = arith.constant dense<0.000000e+00> : vector<2x4x8xf32>
      %167 = tpu.matmul %166, %27, %cst_74 {dimension_numbers = #tpu.dot_dimension_numbers<[2], [1], [1], [2], [0, 0, 0, 1, 1, 2], [0], [0]>} : vector<2x4x12xf32>, vector<2x12x8xf32>, vector<2x4x8xf32> -> vector<2x4x8xf32>
      "tpu.trace_stop"() : () -> ()
      "tpu.trace_start"() <{level = 10 : i32, message = "nqd,nds->nqs"}> : () -> ()
      %cst_75 = arith.constant dense<0.000000e+00> : vector<2x8x8xf32>
      %168 = tpu.matmul %157, %167, %cst_75 {dimension_numbers = #tpu.dot_dimension_numbers<[2], [1], [1], [2], [0, 0, 0, 1, 1, 2], [0], [0]>} : vector<2x8x4xf32>, vector<2x4x8xf32>, vector<2x8x8xf32> -> vector<2x8x8xf32>
      "tpu.trace_stop"() : () -> ()
      %cst_76 = arith.constant 5.000000e-01 : f32
      %169 = vector.broadcast %cst_76 : f32 to vector<2x8x8xf32>
      %170 = arith.mulf %168, %169 : vector<2x8x8xf32>
      %cst_77 = arith.constant dense<0xFF800000> : vector<2x8xf32>
      %171 = vector.multi_reduction <maximumf>, %170, %cst_77 [2] : vector<2x8x8xf32> to vector<2x8xf32>
      %172 = vector.shape_cast %171 : vector<2x8xf32> to vector<2x8x1xf32>
      %173 = vector.broadcast %172 : vector<2x8x1xf32> to vector<2x8x8xf32>
      %174 = arith.subf %170, %173 : vector<2x8x8xf32>
      %175 = math.exp %174 : vector<2x8x8xf32>
      %cst_78 = arith.constant dense<0.000000e+00> : vector<2x8xf32>
      %176 = vector.multi_reduction <add>, %175, %cst_78 [2] : vector<2x8x8xf32> to vector<2x8xf32>
      %177 = vector.shape_cast %176 : vector<2x8xf32> to vector<2x8x1xf32>
      %178 = tpu.reciprocal %177 : vector<2x8x1xf32> -> vector<2x8x1xf32>
      %179 = vector.broadcast %178 : vector<2x8x1xf32> to vector<2x8x8xf32>
      %180 = arith.mulf %175, %179 : vector<2x8x8xf32>
      "tpu.trace_start"() <{level = 10 : i32, message = "nqs,nsd->nqd"}> : () -> ()
      %cst_79 = arith.constant dense<0.000000e+00> : vector<2x8x4xf32>
      %181 = tpu.matmul %180, %164, %cst_79 {dimension_numbers = #tpu.dot_dimension_numbers<[2], [1], [1], [2], [0, 0, 0, 1, 1, 2], [0], [0]>} : vector<2x8x8xf32>, vector<2x8x4xf32>, vector<2x8x4xf32> -> vector<2x8x4xf32>
      "tpu.trace_stop"() : () -> ()
      %182 = vector.shape_cast %181 : vector<2x8x4xf32> to vector<16x4xf32>
      %cst_80 = arith.constant dense<0.000000e+00> : vector<16x12xf32>
      %183 = tpu.matmul %182, %150, %cst_80 {dimension_numbers = #tpu.dot_dimension_numbers<[1], [0], [0], [1], [0, 0, 1, 1], [], []>} : vector<16x4xf32>, vector<4x12xf32>, vector<16x12xf32> -> vector<16x12xf32>
      %184 = arith.addf %132, %183 : vector<16x12xf32>
      %185 = vector.extract_strided_slice %24 {offsets = [6, 0], sizes = [1, 12], strides = [1, 1]} : vector<16x128xf32> to vector<1x12xf32>
      %186 = vector.shape_cast %185 : vector<1x12xf32> to vector<12xf32>
      %187 = vector.shape_cast %186 : vector<12xf32> to vector<1x12xf32>
      %188 = vector.broadcast %187 : vector<1x12xf32> to vector<16x12xf32>
      %189 = arith.addf %184, %188 : vector<16x12xf32>
      %190 = arith.addf %arg8, %189 : vector<16x12xf32>
      %191 = vector.extract_strided_slice %24 {offsets = [7, 0], sizes = [1, 12], strides = [1, 1]} : vector<16x128xf32> to vector<1x12xf32>
      %192 = vector.shape_cast %191 : vector<1x12xf32> to vector<12xf32>
      %193 = vector.extract_strided_slice %24 {offsets = [8, 0], sizes = [1, 12], strides = [1, 1]} : vector<16x128xf32> to vector<1x12xf32>
      %194 = vector.shape_cast %193 : vector<1x12xf32> to vector<12xf32>
      %cst_81 = arith.constant dense<0.000000e+00> : vector<16xf32>
      %195 = vector.multi_reduction <add>, %190, %cst_81 [1] : vector<16x12xf32> to vector<16xf32>
      %196 = vector.shape_cast %195 : vector<16xf32> to vector<16x1xf32>
      %cst_82 = arith.constant 1.200000e+01 : f32
      %197 = vector.broadcast %cst_82 : f32 to vector<16x1xf32>
      %198 = arith.divf %196, %197 : vector<16x1xf32>
      %199 = vector.broadcast %198 : vector<16x1xf32> to vector<16x12xf32>
      %200 = arith.subf %190, %199 : vector<16x12xf32>
      %201 = arith.mulf %200, %200 : vector<16x12xf32>
      %cst_83 = arith.constant dense<0.000000e+00> : vector<16xf32>
      %202 = vector.multi_reduction <add>, %201, %cst_83 [1] : vector<16x12xf32> to vector<16xf32>
      %203 = vector.shape_cast %202 : vector<16xf32> to vector<16x1xf32>
      %cst_84 = arith.constant 1.200000e+01 : f32
      %204 = vector.broadcast %cst_84 : f32 to vector<16x1xf32>
      %205 = arith.divf %203, %204 : vector<16x1xf32>
      %206 = vector.broadcast %198 : vector<16x1xf32> to vector<16x12xf32>
      %207 = arith.subf %190, %206 : vector<16x12xf32>
      %cst_85 = arith.constant 9.99999974E-6 : f32
      %208 = vector.broadcast %cst_85 : f32 to vector<16x1xf32>
      %209 = arith.addf %205, %208 : vector<16x1xf32>
      %210 = math.rsqrt %209 : vector<16x1xf32>
      %211 = vector.broadcast %210 : vector<16x1xf32> to vector<16x12xf32>
      %212 = arith.mulf %207, %211 : vector<16x12xf32>
      %213 = vector.shape_cast %192 : vector<12xf32> to vector<1x12xf32>
      %214 = vector.broadcast %213 : vector<1x12xf32> to vector<16x12xf32>
      %215 = arith.mulf %212, %214 : vector<16x12xf32>
      %216 = vector.shape_cast %194 : vector<12xf32> to vector<1x12xf32>
      %217 = vector.broadcast %216 : vector<1x12xf32> to vector<16x12xf32>
      %218 = arith.addf %215, %217 : vector<16x12xf32>
      %219 = arith.index_cast %arg7 : i32 to index
      %c0_86 = arith.constant 0 : index
      %c0_87 = arith.constant 0 : index
      %220 = vector.load %arg3[%219, %c0_86, %c0_87] : memref<6x12x32xf32, #tpu.memory_space<vmem>>, vector<1x12x32xf32>
      %221 = vector.shape_cast %220 : vector<1x12x32xf32> to vector<12x32xf32>
      %cst_88 = arith.constant dense<0.000000e+00> : vector<16x32xf32>
      %222 = tpu.matmul %218, %221, %cst_88 {dimension_numbers = #tpu.dot_dimension_numbers<[1], [0], [0], [1], [0, 0, 1, 1], [], []>} : vector<16x12xf32>, vector<12x32xf32>, vector<16x32xf32> -> vector<16x32xf32>
      %223 = vector.extract_strided_slice %24 {offsets = [9, 0], sizes = [1, 32], strides = [1, 1]} : vector<16x128xf32> to vector<1x32xf32>
      %224 = vector.shape_cast %223 : vector<1x32xf32> to vector<32xf32>
      %225 = vector.shape_cast %224 : vector<32xf32> to vector<1x32xf32>
      %226 = vector.broadcast %225 : vector<1x32xf32> to vector<16x32xf32>
      %227 = arith.addf %222, %226 : vector<16x32xf32>
      %cst_89 = arith.constant 0.000000e+00 : f32
      %228 = vector.broadcast %cst_89 : f32 to vector<16x32xf32>
      %229 = arith.maximumf %227, %228 : vector<16x32xf32>
      %230 = arith.index_cast %arg7 : i32 to index
      %c0_90 = arith.constant 0 : index
      %c0_91 = arith.constant 0 : index
      %231 = vector.load %arg4[%230, %c0_90, %c0_91] : memref<6x32x12xf32, #tpu.memory_space<vmem>>, vector<1x32x12xf32>
      %232 = vector.shape_cast %231 : vector<1x32x12xf32> to vector<32x12xf32>
      %cst_92 = arith.constant dense<0.000000e+00> : vector<16x12xf32>
      %233 = tpu.matmul %229, %232, %cst_92 {dimension_numbers = #tpu.dot_dimension_numbers<[1], [0], [0], [1], [0, 0, 1, 1], [], []>} : vector<16x32xf32>, vector<32x12xf32>, vector<16x12xf32> -> vector<16x12xf32>
      %234 = vector.extract_strided_slice %24 {offsets = [10, 0], sizes = [1, 12], strides = [1, 1]} : vector<16x128xf32> to vector<1x12xf32>
      %235 = vector.shape_cast %234 : vector<1x12xf32> to vector<12xf32>
      %236 = vector.shape_cast %235 : vector<12xf32> to vector<1x12xf32>
      %237 = vector.broadcast %236 : vector<1x12xf32> to vector<16x12xf32>
      %238 = arith.addf %233, %237 : vector<16x12xf32>
      %239 = arith.addf %218, %238 : vector<16x12xf32>
      %240 = vector.extract_strided_slice %24 {offsets = [11, 0], sizes = [1, 12], strides = [1, 1]} : vector<16x128xf32> to vector<1x12xf32>
      %241 = vector.shape_cast %240 : vector<1x12xf32> to vector<12xf32>
      %242 = vector.extract_strided_slice %24 {offsets = [12, 0], sizes = [1, 12], strides = [1, 1]} : vector<16x128xf32> to vector<1x12xf32>
      %243 = vector.shape_cast %242 : vector<1x12xf32> to vector<12xf32>
      %cst_93 = arith.constant dense<0.000000e+00> : vector<16xf32>
      %244 = vector.multi_reduction <add>, %239, %cst_93 [1] : vector<16x12xf32> to vector<16xf32>
      %245 = vector.shape_cast %244 : vector<16xf32> to vector<16x1xf32>
      %cst_94 = arith.constant 1.200000e+01 : f32
      %246 = vector.broadcast %cst_94 : f32 to vector<16x1xf32>
      %247 = arith.divf %245, %246 : vector<16x1xf32>
      %248 = vector.broadcast %247 : vector<16x1xf32> to vector<16x12xf32>
      %249 = arith.subf %239, %248 : vector<16x12xf32>
      %250 = arith.mulf %249, %249 : vector<16x12xf32>
      %cst_95 = arith.constant dense<0.000000e+00> : vector<16xf32>
      %251 = vector.multi_reduction <add>, %250, %cst_95 [1] : vector<16x12xf32> to vector<16xf32>
      %252 = vector.shape_cast %251 : vector<16xf32> to vector<16x1xf32>
      %cst_96 = arith.constant 1.200000e+01 : f32
      %253 = vector.broadcast %cst_96 : f32 to vector<16x1xf32>
      %254 = arith.divf %252, %253 : vector<16x1xf32>
      %255 = vector.broadcast %247 : vector<16x1xf32> to vector<16x12xf32>
      %256 = arith.subf %239, %255 : vector<16x12xf32>
      %cst_97 = arith.constant 9.99999974E-6 : f32
      %257 = vector.broadcast %cst_97 : f32 to vector<16x1xf32>
      %258 = arith.addf %254, %257 : vector<16x1xf32>
      %259 = math.rsqrt %258 : vector<16x1xf32>
      %260 = vector.broadcast %259 : vector<16x1xf32> to vector<16x12xf32>
      %261 = arith.mulf %256, %260 : vector<16x12xf32>
      %262 = vector.shape_cast %241 : vector<12xf32> to vector<1x12xf32>
      %263 = vector.broadcast %262 : vector<1x12xf32> to vector<16x12xf32>
      %264 = arith.mulf %261, %263 : vector<16x12xf32>
      %265 = vector.shape_cast %243 : vector<12xf32> to vector<1x12xf32>
      %266 = vector.broadcast %265 : vector<1x12xf32> to vector<16x12xf32>
      %267 = arith.addf %264, %266 : vector<16x12xf32>
      scf.yield %267 : vector<16x12xf32>
    }
    %c6_i32_2 = arith.constant 6 : i32
    %4 = vector.extract_strided_slice %3 {offsets = [8, 0], sizes = [8, 12], strides = [1, 1]} : vector<16x12xf32> to vector<8x12xf32>
    %c6 = arith.constant 6 : index
    %c0_3 = arith.constant 0 : index
    %c0_4 = arith.constant 0 : index
    %5 = vector.load %arg5[%c6, %c0_3, %c0_4] : memref<7x16x128xf32, #tpu.memory_space<vmem>>, vector<1x16x128xf32>
    %6 = vector.shape_cast %5 : vector<1x16x128xf32> to vector<16x128xf32>
    %7 = vector.extract_strided_slice %6 {offsets = [0, 0], sizes = [12, 128], strides = [1, 1]} : vector<16x128xf32> to vector<12x128xf32>
    %cst = arith.constant dense<0.000000e+00> : vector<8x128xf32>
    %8 = tpu.matmul %4, %7, %cst {dimension_numbers = #tpu.dot_dimension_numbers<[1], [0], [0], [1], [0, 0, 1, 1], [], []>} : vector<8x12xf32>, vector<12x128xf32>, vector<8x128xf32> -> vector<8x128xf32>
    %9 = vector.extract_strided_slice %6 {offsets = [12, 0], sizes = [1, 128], strides = [1, 1]} : vector<16x128xf32> to vector<1x128xf32>
    %10 = vector.shape_cast %9 : vector<1x128xf32> to vector<128xf32>
    %11 = vector.shape_cast %10 : vector<128xf32> to vector<1x128xf32>
    %12 = vector.broadcast %11 : vector<1x128xf32> to vector<8x128xf32>
    %13 = arith.addf %8, %12 : vector<8x128xf32>
    %cst_5 = arith.constant 5.000000e-01 : f32
    %14 = vector.broadcast %cst_5 : f32 to vector<8x128xf32>
    %15 = arith.mulf %14, %13 : vector<8x128xf32>
    %16 = math.tanh %15 : vector<8x128xf32>
    %cst_6 = arith.constant 1.000000e+00 : f32
    %17 = vector.broadcast %cst_6 : f32 to vector<8x128xf32>
    %18 = arith.addf %16, %17 : vector<8x128xf32>
    %cst_7 = arith.constant 5.000000e-01 : f32
    %19 = vector.broadcast %cst_7 : f32 to vector<8x128xf32>
    %20 = arith.mulf %19, %18 : vector<8x128xf32>
    %c0_8 = arith.constant 0 : index
    %c0_9 = arith.constant 0 : index
    %21 = vector.load %arg6[%c0_8, %c0_9] : memref<8x128xf32, #tpu.memory_space<vmem>>, vector<8x128xf32>
    tpu.vector_store %arg6[%c0_8, %c0_9], %20 {strides = array<i32>} : memref<8x128xf32, #tpu.memory_space<vmem>>, vector<8x128xf32>,
    return
  }
}

</mosaic_0001>

<bundles_post_ra>
// kernel: tpu_custom_call.1
= control target key start
LH: loop header
LB: loop body
LE: loop exit
PB: predicated region body
PF: predicated region fallthrough
CT: control target
= control target key end

     0   :  { %11 = vsyncpa [#allocation3], 0  ;;  %s3182_s25 = smov 0   ;;  %s3490_s0 = inlined_call_operand.vmem [shape: f32[2,8,12], index: 0, kind: input, shape index: {}]   ;;  %s3491_s1 = inlined_call_operand.vmem [shape: f32[36,12,4], index: 1, kind: input, shape index: {}]   ;;  %s3492_s2 = inlined_call_operand.vmem [shape: f32[36,4,12], index: 2, kind: input, shape index: {}]   ;;  %s3493_s3 = inlined_call_operand.vmem [shape: f32[6,12,32], index: 3, kind: input, shape index: {}]   ;;  %s3494_s4 = inlined_call_operand.vmem [shape: f32[6,32,12], index: 4, kind: input, shape index: {}]   ;;  %s3495_s5 = inlined_call_operand.vmem [shape: f32[7,16,128], index: 5, kind: input, shape index: {}]   ;;  %s3496_s6 = inlined_call_operand.hbm [shape: f32[8,128], index: 6, kind: output, shape index: {}]  }
   0x1   :  { %v24_v0 = vld [vmem:[%s3490_s0] sm:$0xff]   ;;  %v25_v1 = vld [vmem:[%s3490_s0 + $0x8] sm:$0xff]  }
   0x2 LB: > { %vm58_vm0 = vcmask 97280   ;;  %v3132_v2 = vmov 0.0   ;;  %s2675_s0 = smul.u32 96, %s3130_s25  ;;  %vm65_vm1 = vcmask 1043456   ;;  %vm3133_vm2 = vmmov 0   ;;  %s2674_s9 = sshll.u32 %s3130_s25, 4  ;;  %s3130_s25 = sphi %s3182_s25, %s31_s25   ;;  %v3126_v0 = vphi %v24_v0, %v2507_v0   ;;  %v3122_v1 = vphi %v25_v1, %v3497_v1  }
   0x3   : > { %2865 = vmatprep.subr.mxu0 %v3132_v2  ;;  %2855 = vmatprep.mubr.msk.f32.mxu1 %vm58_vm0, %v3126_v0  ;;  %s2679_s26 = smul.u32 24, %s3130_s25  ;;  %v54_v8 = vlaneseq  ;;  %s3248_s12 = scalar_lea.vmem %s3495_s5, %s2674_s9  ;;  %vm369_vm3 = vcmask 31744   ;;  %vm524_vm4 = vcmask 64512   ;;  %vm2387_vm5 = vcmask 261120  }
   0x4   : > { %2866 = vmatpush3.xpose.msk.msra.mxu0 %vm58_vm0, %v3126_v0  ;;  %2867 = vmatprep.mubr.msk.f32.mxu0 %vm3133_vm2, %v3132_v2  ;;  %s3206_s29 = scalar_lea.vmem %s3491_s1, %s2675_s0  ;;  %v3252_v12 = vld [vmem:[%s3248_s12] sm:$0xff]  ;;  %s2284_s15 = scalar_lea.vmem %s3493_s3, %s2674_s9 }
   0x5   : > { %2875 = vmatprep.subr.mxu0 %v3132_v2  ;;  %v42_v3 = vld [vmem:[%s3206_s29 + $0x8] sm:$0xf]  ;;  %v41_v4 = vld [vmem:[%s3206_s29] sm:$0xff]  ;;  %s3213_s8 = scalar_lea.vmem %s3492_s2, %s2679_s26  ;;  %v2678_v6 = vld [vmem:[%s3206_s29 + $0x38] sm:$0xf]  ;;  %v3241_v9 = vshrl.u32 %v54_v8, 7 }
   0x6   : > { %2851 = vmatprep.subr.msk.mxu1 %vm65_vm1, %v42_v3  ;;  %v50_v5 = vld [vmem:[%s3213_s8] sm:$0xf]  ;;  %v2677_v7 = vld [vmem:[%s3206_s29 + $0x30] sm:$0xff]  ;;  %v2700_v45 = vld [vmem:[%s3206_s29 + $0x18] sm:$0xf]  ;;  %s2762_s16 = sshll.u32 %s3130_s25, 5 }
   0x7   : > { %2852 = vmatpush3.msk.msra.mxu1 %vm65_vm1, %v42_v3  ;;  %2868 = vmatmul.mubr.msk.f32.vlgmr.msra.gmra.mxu0 %vm58_vm0, %v50_v5  ;;  %v56_v10 = vsub.s32 0, %v3241_v9  ;;  %v146_v16 = vsub.s32 3, %v3241_v9  ;;  %v2703_v46 = vld [vmem:[%s3206_s29 + $0x48] sm:$0xf]  ;;  %v2699_v51 = vld [vmem:[%s3206_s29 + $0x10] sm:$0xff]  ;;  %v2702_v54 = vld [vmem:[%s3206_s29 + $0x40] sm:$0xff]  ;;  %s2378_s19 = scalar_lea.vmem %s3494_s4, %s2762_s16 }
   0x8   : > { %2853 = vmatprep.subr.mxu1 %v41_v4  ;;  %2877 = vmatprep.mubr.msk.f32.mxu0 %vm3133_vm2, %v3132_v2  ;;  %v2705_v55 = vld [vmem:[%s3213_s8 + $0x4] sm:$0xf]  ;;  %v711_v56 = vsub.s32 1, %v3241_v9  ;;  %v3321_v63 = vsub.s32 4, %v3241_v9  ;;  %s31_s25 = sadd.s32 1, %s3130_s25  }
   0x9   : > { %2854 = vmatpush3.msra.mxu1 %v41_v4  ;;  %v57_v15 = vrot.slane %v3252_v12, %v56_v10  ;;  %v147_v20 = vrot.slane %v3252_v12, %v146_v16  ;;  %p28_p0 = scmp.ge.s32.totalorder %s31_s25, 6  }
   0xa   : > { %2856 = vmatmul.mubr.msk.f32.vlgmr.msra.gmra.mxu1 %vm58_vm0, %v3122_v1  ;;  %2858 = vmatprep.subr.msk.mxu1 %vm65_vm1, %v2678_v6  ;;  %v712_v59 = vrot.slane %v3252_v12, %v711_v56  ;;  %vm3135_vm6 = vmmov (%p28_p0), 0   ;;  %s3136_s1 = smov (%p28_p0), [#allocation2]  }
   0xb   : > { %2859 = vmatpush3.msk.msra.mxu1 %vm65_vm1, %v2678_v6  ;;  %2862 = vmatprep.mubr.msk.f32.mxu1 %vm58_vm0, %v3126_v0  ;;  %s2605_s2 = sshll.u32 (%p28_p0), %s3136_s1, 4  ;;  %s2606_s2 = int_to_ptr.vmem [resolvable:$true] %s2605_s2 }
   0xc   : > { %2860 = vmatprep.subr.mxu1 %v2677_v7  ;;  %s3086_s3 = scalar_lea.vmem (%p28_p0), %s2606_s2, 128  ;;  %p3091_p2 = scmp.lt.s32.totalorder (%p28_p0), %s2606_s2, %s2606_s2 }
   0xd   : > { %2861 = vmatpush3.msra.mxu1 %v2677_v7  ;;  %v794_v7 = vrot.slane %v3252_v12, %v3321_v63  ;;  %p3087_p1 = scmp.ne.s32.totalorder (%p28_p0), %s2606_s2, %s3086_s3  ;;  %p3092_p3 = scmp.lt.s32.totalorder (%p28_p0), %s3086_s3, %s3086_s3 }
   0xe   : > { %2863 = vmatmul.mubr.msk.f32.vlgmr.msra.gmra.mxu1 %vm58_vm0, %v3122_v1  ;;  %2870 = vmatprep.subr.mxu1 %v3132_v2 }
   0xf   : > { %2871 = vmatpush3.xpose.msk.msra.mxu1 %vm58_vm0, %v3122_v1  ;;  %2872 = vmatprep.mubr.msk.f32.mxu1 %vm3133_vm2, %v3132_v2  ;;  %p3093_p4 = por (%p28_p0), %p3092_p3, %p3091_p2 }
  0x10   : > { %2880 = vmatprep.subr.mxu1 %v3132_v2 }
  0x11   :  { %p3094_p5 = pnand (%p28_p0), %p3093_p4, %p3087_p1 }
  0x12   : > { %2873 = vmatmul.mubr.msk.f32.vlgmr.msra.gmra.mxu1 %vm58_vm0, %v50_v5 }
  0x13   : > { %2882 = vmatprep.mubr.msk.f32.mxu1 %vm3133_vm2, %v3132_v2 }
  0xc7   : > { %v295_v11 = vpop.f32.mrf.mxu0 }
  0xc8   : > { %2876 = vmatpush3.msk.msra.mxu0 %vm65_vm1, %v295_v11 }
  0xc9   : > { %v2869_v13 = vpop.f32.mrf.mxu0  ;;  %2885 = vmatprep.subr.mxu0 %v3132_v2 }
  0xca   : > { %v2857_v14 = vpop.f32.mrf.mxu1 }
  0xcb   : > { %v141_v23 = vadd.f32 %v2857_v14, %v57_v15 }
  0xcc   : > { %v135_v17 = vpop.f32.mrf.mxu1 }
  0xcd   : > { %v136_v18 = vadd.f32 %v135_v17, %v57_v15 }
  0xce   : > { %v2864_v19 = vpop.f32.mrf.mxu1 }
  0xcf   : > { %2878 = vmatmul.mubr.msk.f32.vlgmr.msra.gmra.mxu0 %vm369_vm3, %v136_v18  ;;  %v223_v25 = vadd.f32 %v2864_v19, %v147_v20 }
  0xd0   : > { %v217_v21 = vpop.f32.mrf.mxu1  ;;  %2887 = vmatprep.mubr.msk.f32.mxu0 %vm3133_vm2, %v3132_v2 }
  0xd1   : > { %v218_v22 = vadd.f32 %v217_v21, %v147_v20 }
  0xd2   : > { %v365_v24 = vpop.f32.mrf.mxu1 }
  0xd3   : > { %2881 = vmatpush3.msk.msra.mxu1 %vm65_vm1, %v365_v24  ;;  %2886 = vmatpush3.msra.mxu0 %v218_v22 }
  0xd4   : > { %v2874_v26 = vpop.f32.mrf.mxu1  ;;  %2883 = vmatmul.mubr.msk.f32.vlgmr.msra.gmra.mxu1 %vm369_vm3, %v141_v23  ;;  %2890 = vmatprep.subr.mxu1 %v3132_v2 }
  0xd5   : > { %2891 = vmatpush3.msra.mxu1 %v223_v25  ;;  %2892 = vmatprep.mubr.msk.f32.mxu1 %vm3133_vm2, %v3132_v2 }
  0xd6   : > { %2895 = vmatprep.subr.msk.mxu0 %vm65_vm1, %v2700_v45  ;;  %2902 = vmatprep.subr.msk.mxu1 %vm65_vm1, %v2703_v46 }
 0x18f   : > { %v442_v27 = vpop.f32.mrf.mxu0 }
 0x190   : > { %v522_v28 = vmul.f32 0.5, %v442_v27 }
 0x191   : > { %v2879_v29 = vpop.f32.mrf.mxu0 }
 0x192   : > { %v525_v30 = vsel %vm524_vm4, %v522_v28, -inf }
 0x193   : > { %526 = vmax.xlane.f32.xlu0 %v525_v30 }
 0x194   : > { %v518_v31 = vpop.f32.mrf.mxu1 }
 0x195   : > { %v523_v32 = vmul.f32 0.5, %v518_v31 }
 0x196   : > { %v2884_v33 = vpop.f32.mrf.mxu1 }
 0x197   : > { %v528_v34 = vsel %vm524_vm4, %v523_v32, -inf }
 0x198   : > { %529 = vmax.xlane.f32.xlu0 %v528_v34 }
 0x21c   : > { %v527_v35 = vpop.xlane.xlu0 %526 }
 0x21d   : > { %v531_v36 = vsub.f32 %v522_v28, %v527_v35 }
 0x21f   : > { %v533_v37 = vmul.f32 1.442695, %v531_v36 }
 0x221   : > { %3052 = vpow2.f32 %v533_v37  ;;  %v530_v38 = vpop.xlane.xlu0 %529  ;;  %v2681_v37 = vld [vmem:[%s3213_s8 + $0xc] sm:$0xf] }
 0x222   : > { %v532_v39 = vsub.f32 %v523_v32, %v530_v38 }
 0x224   : > { %v535_v40 = vmul.f32 1.442695, %v532_v39 }
 0x226   : > { %3054 = vpow2.f32 %v535_v40 }
 0x22e   : > { %v3053_v41 = vpop.eup %3052 }
 0x22f   : > { %v537_v42 = vsel %vm524_vm4, %v3053_v41, 0.0 }
 0x230   : > { %538 = vadd.xlane.f32.xlu1 %v537_v42 }
 0x233   : > { %v3055_v43 = vpop.eup %3054 }
 0x234   : > { %v540_v44 = vsel %vm524_vm4, %v3055_v43, 0.0 }
 0x235   : > { %541 = vadd.xlane.f32.xlu1 %v540_v44  ;;  %v2735_v44 = vld [vmem:[%s3206_s29 + $0x58] sm:$0xf] }
 0x2b9   : > { %v539_v47 = vpop.xlane.xlu1 %538 }
 0x2ba   : > { %3056 = vrcp.f32 %v539_v47  ;;  %v2732_v47 = vld [vmem:[%s3206_s29 + $0x28] sm:$0xf] }
 0x2be   : > { %v542_v48 = vpop.xlane.xlu1 %541 }
 0x2bf   : > { %3058 = vrcp.f32 %v542_v48  ;;  %v2737_v48 = vld [vmem:[%s3213_s8 + $0x8] sm:$0xf] }
 0x2c7   : > { %v3057_v49 = vpop.eup %3056 }
 0x2c8   : > { %v545_v50 = vmul.f32 %v3057_v49, %v3053_v41 }
 0x2ca   : > { %2888 = vmatmul.mubr.msk.f32.vlgmr.msra.gmra.mxu0 %vm524_vm4, %v545_v50 }
 0x2cb   : > { %2896 = vmatpush3.msk.msra.mxu0 %vm65_vm1, %v2700_v45  ;;  %2899 = vmatprep.mubr.msk.f32.mxu0 %vm58_vm0, %v3126_v0  ;;  %v2707_v45 = vld [vmem:[%s3213_s8 + $0x10] sm:$0xf] }
 0x2cc   : > { %v3059_v52 = vpop.eup %3058  ;;  %2897 = vmatprep.subr.mxu0 %v2699_v51 }
 0x2cd   : > { %2898 = vmatpush3.msra.mxu0 %v2699_v51  ;;  %v546_v53 = vmul.f32 %v3059_v52, %v3055_v43  ;;  %v2731_v52 = vld [vmem:[%s3206_s29 + $0x20] sm:$0xff] }
 0x2ce   : > { %2900 = vmatmul.mubr.msk.f32.vlgmr.msra.gmra.mxu0 %vm58_vm0, %v3122_v1  ;;  %2909 = vmatprep.subr.mxu0 %v3132_v2 }
 0x2cf   : > { %2893 = vmatmul.mubr.msk.f32.vlgmr.msra.gmra.mxu1 %vm524_vm4, %v546_v53  ;;  %2910 = vmatpush3.xpose.msk.msra.mxu0 %vm58_vm0, %v3126_v0 }
 0x2d0   : > { %2903 = vmatpush3.msk.msra.mxu1 %vm65_vm1, %v2703_v46  ;;  %2911 = vmatprep.mubr.msk.f32.mxu0 %vm3133_vm2, %v3132_v2  ;;  %v2734_v46 = vld [vmem:[%s3206_s29 + $0x50] sm:$0xff] }
 0x2d1   : > { %2904 = vmatprep.subr.mxu1 %v2702_v54  ;;  %2906 = vmatprep.mubr.msk.f32.mxu1 %vm58_vm0, %v3126_v0 }
 0x2d2   : > { %2905 = vmatpush3.msra.mxu1 %v2702_v54  ;;  %2912 = vmatmul.mubr.msk.f32.vlgmr.msra.gmra.mxu0 %vm58_vm0, %v2705_v55 }
 0x2d3   : > { %2907 = vmatmul.mubr.msk.f32.vlgmr.msra.gmra.mxu1 %vm58_vm0, %v3122_v1  ;;  %2914 = vmatprep.subr.mxu1 %v3132_v2 }
 0x2d4   : > { %2915 = vmatpush3.xpose.msk.msra.mxu1 %vm58_vm0, %v3122_v1  ;;  %2916 = vmatprep.mubr.msk.f32.mxu1 %vm3133_vm2, %v3132_v2 }
 0x2d5   : > { %2919 = vmatprep.subr.mxu0 %v3132_v2  ;;  %2921 = vmatprep.mubr.msk.f32.mxu0 %vm3133_vm2, %v3132_v2 }
 0x2d6   : > { %2924 = vmatprep.subr.mxu1 %v3132_v2 }
 0x2d7   : > { %2917 = vmatmul.mubr.msk.f32.vlgmr.msra.gmra.mxu1 %vm58_vm0, %v2705_v55 }
 0x2d8   : > { %2926 = vmatprep.mubr.msk.f32.mxu1 %vm3133_vm2, %v3132_v2 }
 0x38a   : > { %v3313_v57 = vpop.f32.mrf.mxu0 }
 0x38c   : > { %v2889_v58 = vpop.f32.mrf.mxu0 }
 0x38e   : > { %v2901_v60 = vpop.f32.mrf.mxu0 }
 0x38f   : > { %v3318_v61 = vpop.f32.mrf.mxu1  ;;  %v788_v14 = vadd.f32 %v2901_v60, %v712_v59 }
 0x390   : > { %v782_v62 = vpop.f32.mrf.mxu0 }
 0x391   : > { %v783_v3 = vadd.f32 %v782_v62, %v712_v59  ;;  %v2894_v4 = vpop.f32.mrf.mxu1  ;;  %v1524_v62 = vsub.s32 2, %v3241_v9 }
 0x392   : > { %v942_v5 = vpop.f32.mrf.mxu0 }
 0x393   : > { %v2908_v6 = vpop.f32.mrf.mxu1  ;;  %2920 = vmatpush3.msk.msra.mxu0 %vm65_vm1, %v942_v5  ;;  %v1525_v5 = vrot.slane %v3252_v12, %v1524_v62 }
 0x394   : > { %2922 = vmatmul.mubr.msk.f32.vlgmr.msra.gmra.mxu0 %vm369_vm3, %v783_v3  ;;  %v2913_v8 = vpop.f32.mrf.mxu0  ;;  %2929 = vmatprep.subr.mxu0 %v3132_v2  ;;  %v870_v17 = vadd.f32 %v2908_v6, %v794_v7 }
 0x395   : > { %v864_v11 = vpop.f32.mrf.mxu1  ;;  %2931 = vmatprep.mubr.msk.f32.mxu0 %vm3133_vm2, %v3132_v2 }
 0x396   : > { %v865_v13 = vadd.f32 %v864_v11, %v794_v7 }
 0x397   : > { %v1012_v15 = vpop.f32.mrf.mxu1 }
 0x398   : > { %2925 = vmatpush3.msk.msra.mxu1 %vm65_vm1, %v1012_v15  ;;  %2930 = vmatpush3.msra.mxu0 %v865_v13 }
 0x399   : > { %v2918_v18 = vpop.f32.mrf.mxu1  ;;  %2927 = vmatmul.mubr.msk.f32.vlgmr.msra.gmra.mxu1 %vm369_vm3, %v788_v14  ;;  %2934 = vmatprep.subr.mxu1 %v3132_v2 }
 0x39a   : > { %2935 = vmatpush3.msra.mxu1 %v870_v17  ;;  %2936 = vmatprep.mubr.msk.f32.mxu1 %vm3133_vm2, %v3132_v2 }
 0x39b   : > { %2944 = vmatprep.subr.msk.mxu1 %vm65_vm1, %v2681_v37  ;;  %2939 = vmatprep.subr.msk.mxu0 %vm65_vm1, %v2707_v45 }
 0x454   : > { %v1088_v19 = vpop.f32.mrf.mxu0 }
 0x455   : > { %v1168_v20 = vmul.f32 0.5, %v1088_v19 }
 0x456   : > { %v2923_v21 = vpop.f32.mrf.mxu0 }
 0x457   : > { %v1170_v22 = vsel %vm524_vm4, %v1168_v20, -inf }
 0x458   : > { %1171 = vmax.xlane.f32.xlu0 %v1170_v22 }
 0x459   : > { %v1164_v23 = vpop.f32.mrf.mxu1 }
 0x45a   : > { %v1169_v24 = vmul.f32 0.5, %v1164_v23 }
 0x45b   : > { %v2928_v25 = vpop.f32.mrf.mxu1 }
 0x45c   : > { %v1173_v26 = vsel %vm524_vm4, %v1169_v24, -inf }
 0x45d   : > { %1174 = vmax.xlane.f32.xlu1 %v1173_v26 }
 0x4e1   : > { %v1172_v27 = vpop.xlane.xlu0 %1171 }
 0x4e2   : > { %v1176_v28 = vsub.f32 %v1168_v20, %v1172_v27 }
 0x4e4   : > { %v1178_v29 = vmul.f32 1.442695, %v1176_v28 }
 0x4e6   : > { %3060 = vpow2.f32 %v1178_v29  ;;  %v1175_v30 = vpop.xlane.xlu1 %1174 }
 0x4e7   : > { %v1177_v31 = vsub.f32 %v1169_v24, %v1175_v30 }
 0x4e9   : > { %v1180_v32 = vmul.f32 1.442695, %v1177_v31 }
 0x4eb   : > { %3062 = vpow2.f32 %v1180_v32 }
 0x4f3   : > { %v3061_v33 = vpop.eup %3060 }
 0x4f4   : > { %v1182_v34 = vsel %vm524_vm4, %v3061_v33, 0.0 }
 0x4f5   : > { %1183 = vadd.xlane.f32.xlu0 %v1182_v34 }
 0x4f8   : > { %v3063_v35 = vpop.eup %3062 }
 0x4f9   : > { %v1185_v36 = vsel %vm524_vm4, %v3063_v35, 0.0 }
 0x4fa   : > { %1186 = vadd.xlane.f32.xlu1 %v1185_v36 }
 0x57e   : > { %v1184_v38 = vpop.xlane.xlu0 %1183 }
 0x57f   : > { %3064 = vrcp.f32 %v1184_v38 }
 0x583   : > { %v1187_v39 = vpop.xlane.xlu1 %1186 }
 0x584   : > { %3066 = vrcp.f32 %v1187_v39 }
 0x58c   : > { %v3065_v40 = vpop.eup %3064 }
 0x58d   : > { %v1190_v41 = vmul.f32 %v3065_v40, %v3061_v33 }
 0x58f   : > { %2932 = vmatmul.mubr.msk.f32.vlgmr.msra.gmra.mxu0 %vm524_vm4, %v1190_v41 }
 0x590   : > { %2940 = vmatpush3.msk.msra.mxu0 %vm65_vm1, %v2707_v45 }
 0x591   : > { %v3067_v42 = vpop.eup %3066  ;;  %2949 = vmatprep.subr.msk.mxu0 %vm65_vm1, %v2732_v47 }
 0x592   : > { %v1191_v43 = vmul.f32 %v3067_v42, %v3063_v35  ;;  %v2739_v42 = vld [vmem:[%s3213_s8 + $0x14] sm:$0xf] }
 0x594   : > { %2937 = vmatmul.mubr.msk.f32.vlgmr.msra.gmra.mxu1 %vm524_vm4, %v1191_v43 }
 0x595   : > { %2946 = vmatprep.mubr.msk.f32.mxu1 %vm369_vm3, %v3313_v57  ;;  %2945 = vmatpush3.msk.msra.mxu1 %vm65_vm1, %v2681_v37 }
 0x596   : > { %2956 = vmatprep.subr.msk.mxu1 %vm65_vm1, %v2735_v44 }
 0x598   : > { %2947 = vmatmul.mubr.msk.f32.vlgmr.msra.gmra.mxu1 %vm369_vm3, %v3318_v61  ;;  %v1606_v61 = vsub.s32 5, %v3241_v9 }
 0x599   : > { %2960 = vmatprep.mubr.msk.f32.mxu1 %vm58_vm0, %v3126_v0  ;;  %2957 = vmatpush3.msk.msra.mxu1 %vm65_vm1, %v2735_v44 }
 0x59a   : > { %2958 = vmatprep.subr.mxu1 %v2734_v46  ;;  %v1607_v4 = vrot.slane %v3252_v12, %v1606_v61 }
 0x59b   : > { %2959 = vmatpush3.msra.mxu1 %v2734_v46 }
 0x59c   : > { %2961 = vmatmul.mubr.msk.f32.vlgmr.msra.gmra.mxu1 %vm58_vm0, %v3122_v1  ;;  %2968 = vmatprep.subr.mxu1 %v3132_v2 }
 0x59d   : > { %2969 = vmatpush3.xpose.msk.msra.mxu1 %vm58_vm0, %v3122_v1  ;;  %2970 = vmatprep.mubr.msk.f32.mxu1 %vm3133_vm2, %v3132_v2 }
 0x59e   : > { %2978 = vmatprep.subr.mxu1 %v3132_v2 }
 0x5a0   : > { %2971 = vmatmul.mubr.msk.f32.vlgmr.msra.gmra.mxu1 %vm58_vm0, %v2737_v48 }
 0x5a1   : > { %2980 = vmatprep.mubr.msk.f32.mxu1 %vm3133_vm2, %v3132_v2 }
 0x64f   : > { %v1261_v49 = vpop.f32.mrf.mxu0 }
 0x650   : > { %2941 = vmatprep.mubr.msk.f32.mxu0 %vm369_vm3, %v1261_v49 }
 0x651   : > { %v2933_v50 = vpop.f32.mrf.mxu0 }
 0x654   : > { %v1334_v51 = vpop.f32.mrf.mxu1 }
 0x655   : > { %2942 = vmatmul.mubr.msk.f32.vlgmr.msra.gmra.mxu0 %vm369_vm3, %v1334_v51 }
 0x656   : > { %v2938_v53 = vpop.f32.mrf.mxu1  ;;  %2950 = vmatpush3.msk.msra.mxu0 %vm65_vm1, %v2732_v47  ;;  %2953 = vmatprep.mubr.msk.f32.mxu0 %vm58_vm0, %v3126_v0  ;;  %v2239_v47 = vsub.s32 6, %v3241_v9 }
 0x657   : > { %2951 = vmatprep.subr.mxu0 %v2731_v52 }
 0x658   : > { %2952 = vmatpush3.msra.mxu0 %v2731_v52  ;;  %v3388_v54 = vpop.f32.mrf.mxu1  ;;  %v2240_v49 = vrot.slane %v3252_v12, %v2239_v47 }
 0x659   : > { %2954 = vmatmul.mubr.msk.f32.vlgmr.msra.gmra.mxu0 %vm58_vm0, %v3122_v1  ;;  %2963 = vmatprep.subr.mxu0 %v3132_v2 }
 0x65a   : > { %2964 = vmatpush3.xpose.msk.msra.mxu0 %vm58_vm0, %v3126_v0  ;;  %2965 = vmatprep.mubr.msk.f32.mxu0 %vm3133_vm2, %v3132_v2  ;;  %v3390_v55 = vpop.f32.mrf.mxu1 }
 0x65b   : > { %2973 = vmatprep.subr.mxu0 %v3132_v2 }
 0x65c   : > { %v2962_v57 = vpop.f32.mrf.mxu1 }
 0x65d   : > { %2966 = vmatmul.mubr.msk.f32.vlgmr.msra.gmra.mxu0 %vm58_vm0, %v2737_v48  ;;  %v1683_v7 = vadd.f32 %v2962_v57, %v1607_v4 }
 0x65e   : > { %2975 = vmatprep.mubr.msk.f32.mxu0 %vm3133_vm2, %v3132_v2  ;;  %v1677_v58 = vpop.f32.mrf.mxu1 }
 0x65f   : > { %v1678_v17 = vadd.f32 %v1677_v58, %v1607_v4 }
 0x660   : > { %v1825_v59 = vpop.f32.mrf.mxu1 }
 0x661   : > { %2979 = vmatpush3.msk.msra.mxu1 %vm65_vm1, %v1825_v59 }
 0x662   : > { %2988 = vmatprep.subr.mxu1 %v3132_v2  ;;  %v2972_v60 = vpop.f32.mrf.mxu1 }
 0x715   : > { %v3396_v3 = vpop.f32.mrf.mxu0 }
 0x716   : > { %v1503_v48 = vadd.f32 %v3388_v54, %v3396_v3 }
 0x717   : > { %v3402_v6 = vpop.f32.mrf.mxu0 }
 0x718   : > { %v1498_v51 = vadd.f32 %v3390_v55, %v3402_v6 }
 0x719   : > { %v2955_v8 = vpop.f32.mrf.mxu0 }
 0x71a   : > { %v1601_v11 = vadd.f32 %v2955_v8, %v1525_v5 }
 0x71b   : > { %v1595_v13 = vpop.f32.mrf.mxu0 }
 0x71c   : > { %v1596_v14 = vadd.f32 %v1595_v13, %v1525_v5  ;;  %2981 = vmatmul.mubr.msk.f32.vlgmr.msra.gmra.mxu1 %vm369_vm3, %v1601_v11 }
 0x71d   : > { %v1755_v15 = vpop.f32.mrf.mxu0  ;;  %2989 = vmatpush3.msra.mxu1 %v1683_v7  ;;  %2990 = vmatprep.mubr.msk.f32.mxu1 %vm3133_vm2, %v3132_v2 }
 0x71e   : > { %2974 = vmatpush3.msk.msra.mxu0 %vm65_vm1, %v1755_v15  ;;  %v2285_v15 = vld [vmem:[%s2284_s15] sm:$0xff] }
 0x71f   : > { %v2967_v18 = vpop.f32.mrf.mxu0  ;;  %2976 = vmatmul.mubr.msk.f32.vlgmr.msra.gmra.mxu0 %vm369_vm3, %v1596_v14  ;;  %2983 = vmatprep.subr.mxu0 %v3132_v2 }
 0x720   : > { %2984 = vmatpush3.msra.mxu0 %v1678_v17  ;;  %2985 = vmatprep.mubr.msk.f32.mxu0 %vm3133_vm2, %v3132_v2 }
 0x721   : > { %2993 = vmatprep.subr.msk.mxu0 %vm65_vm1, %v2739_v42 }
 0x7dc   : > { %v1977_v19 = vpop.f32.mrf.mxu1 }
 0x7dd   : > { %v1982_v20 = vmul.f32 0.5, %v1977_v19 }
 0x7de   : > { %v2982_v21 = vpop.f32.mrf.mxu1 }
 0x7df   : > { %v1901_v22 = vpop.f32.mrf.mxu0  ;;  %v1986_v23 = vsel %vm524_vm4, %v1982_v20, -inf }
 0x7e0   : > { %v1981_v24 = vmul.f32 0.5, %v1901_v22  ;;  %1987 = vmax.xlane.f32.xlu1 %v1986_v23  ;;  %v2274_v23 = vsub.s32 7, %v3241_v9  ;;  %v2766_v9 = vld [vmem:[%s3495_s5 + $0x68] sm:$0xff] (%p28_p0) }
 0x7e1   : > { %v2977_v25 = vpop.f32.mrf.mxu0 }
 0x7e2   : > { %v1983_v26 = vsel %vm524_vm4, %v1981_v24, -inf  ;;  %v2275_v25 = vrot.slane %v3252_v12, %v2274_v23  ;;  %v2382_v12 = vld [vmem:[%s2378_s19 + $0x18] sm:$0xff] }
 0x7e3   : > { %1984 = vmax.xlane.f32.xlu0 %v1983_v26  ;;  %v3445_v26 = vld [vmem:[%s3248_s12 + $0x8] sm:$0xff] }
 0x869   : > { %v1988_v27 = vpop.xlane.xlu1 %1987 }
 0x86a   : > { %v1990_v28 = vsub.f32 %v1982_v20, %v1988_v27 }
 0x86c   : > { %v1993_v29 = vmul.f32 1.442695, %v1990_v28  ;;  %v1985_v30 = vpop.xlane.xlu0 %1984 }
 0x86d   : > { %v1989_v31 = vsub.f32 %v1981_v24, %v1985_v30  ;;  %v2281_v30 = vrot.slane %v3445_v26, %v56_v10  ;;  %v2380_v10 = vld [vmem:[%s2378_s19 + $0x8] sm:$0xff] }
 0x86e   : > { %3068 = vpow2.f32 %v1993_v29 }
 0x86f   : > { %v1991_v32 = vmul.f32 1.442695, %v1989_v31 }
 0x871   : > { %3070 = vpow2.f32 %v1991_v32 }
 0x87b   : > { %v3069_v2 = vpop.eup %3068 }
 0x87c   : > { %v1998_v33 = vsel %vm524_vm4, %v3069_v2, 0.0 }
 0x87d   : > { %1999 = vadd.xlane.f32.xlu1 %v1998_v33 }
 0x87e   : > { %v3071_v34 = vpop.eup %3070 }
 0x87f   : > { %v1995_v35 = vsel %vm524_vm4, %v3071_v34, 0.0 }
 0x880   : > { %1996 = vadd.xlane.f32.xlu0 %v1995_v35  ;;  %v2379_v35 = vld [vmem:[%s2378_s19] sm:$0xff] }
 0x906   : > { %v2000_v36 = vpop.xlane.xlu1 %1999 }
 0x907   : > { %3072 = vrcp.f32 %v2000_v36  ;;  %v2290_v36 = vrot.slane %v3445_v26, %v711_v56 }
 0x909   : > { %v1997_v37 = vpop.xlane.xlu0 %1996 }
 0x90a   : > { %3074 = vrcp.f32 %v1997_v37 }
 0x914   : > { %v3073_v38 = vpop.eup %3072 }
 0x915   : > { %v2004_v39 = vmul.f32 %v3073_v38, %v3069_v2 }
 0x917   : > { %v3075_v40 = vpop.eup %3074  ;;  %2991 = vmatmul.mubr.msk.f32.vlgmr.msra.gmra.mxu1 %vm524_vm4, %v2004_v39 }
 0x918   : > { %v2003_v41 = vmul.f32 %v3075_v40, %v3071_v34  ;;  %v2381_v34 = vld [vmem:[%s2378_s19 + $0x10] sm:$0xff] }
 0x91a   : > { %2986 = vmatmul.mubr.msk.f32.vlgmr.msra.gmra.mxu0 %vm524_vm4, %v2003_v41 }
 0x91b   : > { %2994 = vmatpush3.msk.msra.mxu0 %vm65_vm1, %v2739_v42 }
 0x91c   : > { %3005 = vmatprep.subr.mxu0 %v2382_v12 }
 0x9d7   : > { %v2147_v43 = vpop.f32.mrf.mxu1 }
 0x9d9   : > { %v2992_v44 = vpop.f32.mrf.mxu1 }
 0x9da   : > { %v2074_v45 = vpop.f32.mrf.mxu0 }
 0x9db   : > { %2995 = vmatprep.mubr.msk.f32.mxu0 %vm369_vm3, %v2074_v45 }
 0x9dc   : > { %v2987_v46 = vpop.f32.mrf.mxu0  ;;  %2996 = vmatmul.mubr.msk.f32.vlgmr.msra.gmra.mxu0 %vm369_vm3, %v2147_v43  ;;  %v2386_v43 = vrot.slane %v3445_v26, %v1524_v62 }
 0x9dd   : > { %3006 = vmatpush3.msra.mxu0 %v2382_v12 }
 0x9de   : > { %3007 = vmatprep.subr.mxu0 %v2381_v34 }
 0x9df   : > { %3008 = vmatpush3.msra.mxu0 %v2381_v34 }
 0x9e0   : > { %3009 = vmatprep.subr.mxu0 %v2380_v10 }
 0x9e1   : > { %3010 = vmatpush3.msra.mxu0 %v2380_v10 }
 0x9e2   : > { %3011 = vmatprep.subr.mxu0 %v2379_v35 }
 0x9e3   : > { %3012 = vmatpush3.msra.mxu0 %v2379_v35 }
 0xa9c   : > { %v2997_v50 = vpop.f32.mrf.mxu0 }
 0xa9d   : > { %v2236_v52 = vadd.f32 %v2997_v50, %v1503_v48 }
 0xa9e   : > { %v2226_v53 = vpop.f32.mrf.mxu0 }
 0xa9f   : > { %v2242_v57 = vadd.f32 %v2240_v49, %v2236_v52  ;;  %v2235_v58 = vadd.f32 %v2226_v53, %v1498_v51 }
 0xaa1   : > { %v2241_v59 = vadd.f32 %v2240_v49, %v2235_v58  ;;  %v2244_v60 = vadd.f32 %v3122_v1, %v2242_v57 }
 0xaa3   : > { %v2248_v61 = vsel %vm58_vm0, %v2244_v60, 0.0  ;;  %v2243_v4 = vadd.f32 %v3126_v0, %v2241_v59  ;;  %v2286_v0 = vld [vmem:[%s2284_s15 + $0x8] sm:$0xf] }
 0xaa4   : > { %2249 = vadd.xlane.f32.xlu1 %v2248_v61  ;;  %2998 = vmatprep.subr.msk.mxu1 %vm65_vm1, %v2286_v0 }
 0xaa5   : > { %v2245_v54 = vsel %vm58_vm0, %v2243_v4, 0.0  ;;  %2999 = vmatpush3.msk.msra.mxu1 %vm65_vm1, %v2286_v0 }
 0xaa6   : > { %2246 = vadd.xlane.f32.xlu0 %v2245_v54  ;;  %3000 = vmatprep.subr.mxu1 %v2285_v15 }
 0xaa7   : > { %3001 = vmatpush3.msra.mxu1 %v2285_v15 }
 0xb2d   : > { %v2250_v3 = vpop.xlane.xlu1 %2249 }
 0xb2e   : > { %v2253_v5 = vmul.f32 0.083333336, %v2250_v3 }
 0xb2f   : > { %v2247_v7 = vpop.xlane.xlu0 %2246 }
 0xb30   : > { %v2255_v55 = vsub.f32 %v2244_v60, %v2253_v5  ;;  %v2252_v6 = vmul.f32 0.083333336, %v2247_v7 }
 0xb32   : > { %v2254_v8 = vsub.f32 %v2243_v4, %v2252_v6  ;;  %v2257_v11 = vmul.f32 %v2255_v55, %v2255_v55 }
 0xb34   : > { %v2261_v13 = vsel %vm58_vm0, %v2257_v11, 0.0  ;;  %v2256_v14 = vmul.f32 %v2254_v8, %v2254_v8 }
 0xb35   : > { %2262 = vadd.xlane.f32.xlu1 %v2261_v13  ;;  %v2506_v13 = vrot.slane %v3445_v26, %v3321_v63 }
 0xb36   : > { %v2258_v1 = vsel %vm58_vm0, %v2256_v14, 0.0 }
 0xb37   : > { %2259 = vadd.xlane.f32.xlu0 %v2258_v1 }
 0xbbe   : > { %v2263_v17 = vpop.xlane.xlu1 %2262 }
 0xbbf   : > { %v2265_v18 = vmul.f32 0.083333336, %v2263_v17 }
 0xbc0   : > { %v2260_v19 = vpop.xlane.xlu0 %2259 }
 0xbc1   : > { %v2267_v20 = vadd.f32 1e-05, %v2265_v18  ;;  %v2264_v21 = vmul.f32 0.083333336, %v2260_v19  ;;  %v2765_v19 = vld [vmem:[%s3495_s5 + $0x60] sm:$0xff] (%p28_p0) }
 0xbc3   : > { %3076 = vrsqrt.f32 %v2267_v20  ;;  %v2266_v22 = vadd.f32 1e-05, %v2264_v21  ;;  %v2515_v20 = vrot.slane (%p28_p0), %v2766_v9, %v3321_v63 }
 0xbc5   : > { %3078 = vrsqrt.f32 %v2266_v22 }
 0xbd0   : > { %v3077_v24 = vpop.eup %3076 }
 0xbd1   : > { %v2271_v27 = vmul.f32 %v3077_v24, %v2255_v55 }
 0xbd2   : > { %v3079_v28 = vpop.eup %3078 }
 0xbd3   : > { %v2270_v29 = vmul.f32 %v3079_v28, %v2254_v8  ;;  %v2277_v31 = vmul.f32 %v2275_v25, %v2271_v27  ;;  %v2500_v8 = vrot.slane %v3445_v26, %v146_v16  ;;  %v3134_v16 = vmov (%p28_p0), 0.0  }
 0xbd4   :  { %3016 = vmatprep.subr.mxu0 (%p28_p0), %v3134_v16 }
 0xbd5   : > { %v2276_v32 = vmul.f32 %v2275_v25, %v2270_v29  ;;  %v2283_v33 = vadd.f32 %v2281_v30, %v2277_v31 }
 0xbd7   : > { %v2282_v2 = vadd.f32 %v2281_v30, %v2276_v32 }
 0xbd9   : > { %3002 = vmatprep.mubr.msk.f32.mxu1 %vm58_vm0, %v2282_v2 }
 0xbda   : > { %3003 = vmatmul.mubr.msk.f32.vlgmr.msra.gmra.mxu1 %vm58_vm0, %v2283_v33 }
 0xc9a   : > { %v3004_v37 = vpop.f32.mrf.mxu1 }
 0xc9b   : > { %v2372_v38 = vadd.f32 %v3004_v37, %v2290_v36 }
 0xc9c   : > { %v2366_v39 = vpop.f32.mrf.mxu1 }
 0xc9d   : > { %v2367_v40 = vadd.f32 %v2366_v39, %v2290_v36  ;;  %v2376_v42 = vmax.f32 %v2372_v38, 0.0 }
 0xc9f   : > { %v2375_v41 = vmax.f32 %v2367_v40, 0.0 }
 0xca1   : > { %3013 = vmatprep.mubr.msk.f32.mxu0 %vm2387_vm5, %v2375_v41 }
 0xca2   : > { %3014 = vmatmul.mubr.msk.f32.vlgmr.msra.gmra.mxu0 %vm2387_vm5, %v2376_v42 }
 0xca3   :  { %3020 = vmatprep.mubr.msk.f32.mxu0 (%p28_p0), %vm3135_vm6, %v3134_v16  ;;  %3017 = vmatpush3.msk.msra.mxu0 (%p28_p0), %vm65_vm1, %v2766_v9 }
 0xca4   :  { %3018 = vmatprep.subr.mxu0 (%p28_p0), %v3134_v16 }
 0xca5   :  { %3019 = vmatpush3.msra.mxu0 (%p28_p0), %v2765_v19 }
 0xd62   : > { %v3015_v44 = vpop.f32.mrf.mxu0 }
 0xd63   : > { %v2466_v45 = vadd.f32 %v3015_v44, %v2386_v43 }
 0xd64   : > { %v2460_v46 = vpop.f32.mrf.mxu0 }
 0xd65   : > { %v2461_v47 = vadd.f32 %v2460_v46, %v2386_v43  ;;  %v2470_v48 = vadd.f32 %v2466_v45, %v2283_v33 }
 0xd67   : > { %v2474_v56 = vsel %vm58_vm0, %v2470_v48, 0.0  ;;  %v2469_v49 = vadd.f32 %v2461_v47, %v2282_v2 }
 0xd68   : > { %2475 = vadd.xlane.f32.xlu1 %v2474_v56 }
 0xd69   : > { %v2471_v50 = vsel %vm58_vm0, %v2469_v49, 0.0 }
 0xd6a   : > { %2472 = vadd.xlane.f32.xlu0 %v2471_v50 }
 0xdf1   : > { %v2476_v51 = vpop.xlane.xlu1 %2475 }
 0xdf2   : > { %v2478_v52 = vmul.f32 0.083333336, %v2476_v51 }
 0xdf3   : > { %v2473_v53 = vpop.xlane.xlu0 %2472 }
 0xdf4   : > { %v2480_v57 = vsub.f32 %v2470_v48, %v2478_v52  ;;  %v2477_v58 = vmul.f32 0.083333336, %v2473_v53 }
 0xdf6   : > { %v2479_v59 = vsub.f32 %v2469_v49, %v2477_v58  ;;  %v2482_v60 = vmul.f32 %v2480_v57, %v2480_v57 }
 0xdf8   : > { %v2486_v62 = vsel %vm58_vm0, %v2482_v60, 0.0  ;;  %v2481_v61 = vmul.f32 %v2479_v59, %v2479_v59 }
 0xdf9   : > { %2487 = vadd.xlane.f32.xlu1 %v2486_v62 }
 0xdfa   : > { %v2483_v4 = vsel %vm58_vm0, %v2481_v61, 0.0 }
 0xdfb   : > { %2484 = vadd.xlane.f32.xlu0 %v2483_v4 }
 0xe82   : > { %v2488_v54 = vpop.xlane.xlu1 %2487 }
 0xe83   : > { %v2490_v3 = vmul.f32 0.083333336, %v2488_v54 }
 0xe84   : > { %v2485_v5 = vpop.xlane.xlu0 %2484 }
 0xe85   : > { %v2492_v7 = vadd.f32 1e-05, %v2490_v3  ;;  %v2489_v55 = vmul.f32 0.083333336, %v2485_v5 }
 0xe87   : > { %3080 = vrsqrt.f32 %v2492_v7  ;;  %v2491_v6 = vadd.f32 1e-05, %v2489_v55 }
 0xe89   : > { %3082 = vrsqrt.f32 %v2491_v6 }
 0xe94   : > { %v3081_v11 = vpop.eup %3080 }
 0xe95   : > { %v2496_v14 = vmul.f32 %v3081_v11, %v2480_v57 }
 0xe96   : > { %v3083_v1 = vpop.eup %3082 }
 0xe97   : > { %v2502_v0 = vmul.f32 %v2500_v8, %v2496_v14  ;;  %v2495_v15 = vmul.f32 %v3083_v1, %v2479_v59  ;;  %30 = sbr.rel (!%p28_p0) target bundleno = 2 (0x2), region = 67 }
 0xe99   : > { %v2508_v17 = vadd.f32 %v2506_v13, %v2502_v0   ;;  %v2501_v18 = vmul.f32 %v2500_v8, %v2495_v15 }
 0xe9b   : > { %v2507_v0 = vadd.f32 %v2506_v13, %v2501_v18   ;;  %v3497_v1 = vmov %v2508_v17  ;;  %3021 = vmatmul.mubr.msk.f32.vlgmr.msra.gmra.mxu0 (%p28_p0), %vm58_vm0, %v2508_v17 }
 0xf5b   :  { %v2590_v21 = vpop.f32.mrf.mxu0 }
 0xf5c   :  { %v2591_v22 = vadd.f32 %v2590_v21, %v2515_v20 }
 0xf5d   :  { %v3022_v23 = vpop.f32.mrf.mxu0 }
 0xf5e   :  { %v2594_v24 = vmul.f32 0.5, %v2591_v22 }
 0xf60   :  { %3084 = vtanh.f32 %v2594_v24 }
 0xf6d   :  { %v3085_v25 = vpop.eup %3084 }
 0xf6e   :  { %v2596_v26 = vadd.f32 1.0, %v3085_v25 }
 0xf70   :  { %v2597_v27 = vmul.f32 0.5, %v2596_v26 }
 0xf72   :  { %2598 = vst [vmem:[#allocation2] sm:$0xff] %v2597_v27 }
 0xf73   :  { %3097 = shalt.err (!%p3094_p5)
}
 0xf74   :  { %2608 = dma.vmem_to_hbm [thread:$0]  %s2606_s2, 128, %s3496_s6, [#allocation3]  }
 0xf75   :  { %3118 = dma.done.wait [#allocation3], 128  }
 0xf76   :  { %3119 = vsyncadd [#allocation3], 4294967168 }
 0xf77   :  { %2612 = vsyncpa [#allocation3], 1 }

</bundles_post_ra>
